<compile_context>
chip_gen: v7x
topology: tpu7x:2x2x1
jax: 0.10.0
libtpu: 0.0.40
codegen_flags: <defaults>
</compile_context>

<pallas_src>
import jax
import jax.numpy as jnp
from jax.experimental import pallas as pl
from jax.experimental.pallas import tpu as pltpu


HIDDEN_DIMS = [256, 128, 128, 64, 16]
_LANES = 128
_SUBLANES = 8           # f32 sublane granularity: batch tiles are multiples of 8


def _round_up(x, m):
    return (x + m - 1) // m * m


def _cdiv(a, b):
    return (a + b - 1) // b


def _critic_mlp_kernel(x_ref, *refs):
    """refs = (w0, b0, w1, b1, ..., w5, b5, out_ref).

    Layers 0..4: h = relu(h @ W + b)   (bf16 MXU inputs, f32 accumulation,
                                        f32 bias/ReLU on the VPU)
    Layer 5    : 1-wide head as an in-lane reduce against a (1, hidden_pad)
                 weight row; result written as a (tb, 1) column.
    """
    param_refs = refs[:-1]
    out_ref = refs[-1]
    n_layers = len(param_refs) // 2

    # In-kernel bf16 cast of the streamed f32 tile (avoids a separate
    # wrapper-side cast+pad pass over HBM).
    h = x_ref[...].astype(jnp.bfloat16)                       # (tb, flat_dim)
    for layer in range(n_layers - 1):
        w = param_refs[2 * layer][...]                        # (in_pad, out_pad) bf16
        b = param_refs[2 * layer + 1][...]                    # (1, out_pad) f32
        h = jnp.dot(h, w, preferred_element_type=jnp.float32) + b
        h = jnp.maximum(h, 0.0)                               # ReLU in f32 (VPU)
        if layer < n_layers - 2:                              # keep f32 before head
            h = h.astype(jnp.bfloat16)

    # Head: Linear(hidden_pad -> 1) as multiply + lane reduce (no transpose).
    w_row = param_refs[-2][...]                               # (1, hidden_pad) f32
    b_last = param_refs[-1][...]                              # (1, 1) f32
    y = jnp.sum(h * w_row, axis=-1, keepdims=True) + b_last   # (tb, 1) f32
    out_ref[...] = y.astype(out_ref.dtype)


def _pack_params(params):
    """Pad hidden widths to 128-lane multiples (zero cols/rows + zero biases,
    exact). Hidden-layer weights in bf16 (MXU native); biases f32 (1, out_pad).
    The head weight is stored as a (1, hidden_pad) f32 row for the in-lane
    reduce; the head bias is (1, 1) f32."""
    n = len(params)
    flat = []
    prev_out_pad = None
    for idx, (w, b) in enumerate(params):
        fan_in, fan_out = w.shape
        # NOTE: layer-0 K (= flat_dim) is intentionally left unpadded so the
        # wrapper never has to rewrite x in HBM; a non-128-multiple K only
        # costs some MXU feed efficiency on the first matmul.
        in_pad = fan_in if idx == 0 else prev_out_pad
        if idx == n - 1:
            w_row = jnp.zeros((1, in_pad), jnp.float32)
            w_row = w_row.at[0, :fan_in].set(w[:, 0].astype(jnp.float32))
            b_p = b.astype(jnp.float32).reshape(1, 1)
            flat += [w_row, b_p]
        else:
            out_pad = _round_up(fan_out, _LANES)
            w_p = jnp.zeros((in_pad, out_pad), jnp.bfloat16)
            w_p = w_p.at[:fan_in, :fan_out].set(w.astype(jnp.bfloat16))
            b_p = jnp.zeros((1, out_pad), jnp.float32)
            b_p = b_p.at[0, :fan_out].set(b.astype(jnp.float32))
            flat += [w_p, b_p]
            prev_out_pad = out_pad
    return flat


def _vmem_capacity_bytes():
    try:
        cap = getattr(pltpu.get_tpu_info(), "vmem_capacity_bytes", None)
        if cap:
            return int(cap)
    except Exception:
        pass
    return 64 * 1024 * 1024            # conservative default (v7x per-core)


def _pick_batch_tile(batch, flat_dim, param_bytes, vmem_cap, max_tile=2048):
    """Largest batch tile (multiple of 8) whose double-buffered f32 input tile
    + intermediates fit next to the resident parameters inside ~3/4 of
    physical VMEM; keeps >=2 grid tiles for mid/large batches so the
    'parallel' grid axis can split across v7x's two TensorCores."""
    b_ceil = _round_up(max(batch, 1), _SUBLANES)
    per_row = (2 * flat_dim * 4          # double-buffered f32 input tile
               + 2 * 4                   # double-buffered f32 output column
               + 256 * (4 + 2)           # widest f32 accumulator + bf16 copy
               + 3 * _LANES * 4)         # remaining layer intermediates
    budget = (3 * vmem_cap) // 4 - 2 * param_bytes - (2 << 20)   # headroom
    budget = max(budget, per_row * _SUBLANES)
    tb_cap = max(_SUBLANES, (budget // per_row) // _SUBLANES * _SUBLANES)
    tb = min(max_tile, b_ceil, tb_cap)
    if b_ceil > 256 and tb >= b_ceil:    # give v7x's second TC work
        tb = _round_up(_cdiv(b_ceil, 2), _SUBLANES)
    num_tiles = _cdiv(b_ceil, tb)
    return tb, num_tiles, num_tiles * tb


def critic_forward(external, params):
    """external: (B, max_length, input_dim) float32. params: list of (W, b)
    with W stored as (in_features, out_features)."""
    batch = external.shape[0]
    x = external.reshape(batch, -1)                 # nn.Flatten (row-major), f32
    flat_dim = x.shape[1]

    flat_params = _pack_params(params)
    param_bytes = sum(int(p.size) * p.dtype.itemsize for p in flat_params)

    vmem_cap = _vmem_capacity_bytes()
    tb, num_tiles, b_pad = _pick_batch_tile(batch, flat_dim, param_bytes, vmem_cap)
    vmem_limit = (3 * vmem_cap) // 4

    if b_pad != batch:                              # only when batch % 8 != 0
        x = jnp.pad(x, ((0, b_pad - batch), (0, 0)))

    x_spec = pl.BlockSpec((tb, flat_dim), lambda i: (i, 0))
    # TODO(synk): sweep pipeline_mode=pl.Buffered(3) on x_spec for very large
    # flat_dim if DMA issue latency at grid-step boundaries shows up.

    def param_specs(pin):
        if pin:
            # Constant-index blocks: single resident buffer, DMA'd once.
            return [pl.BlockSpec(p.shape, lambda i: (0, 0),
                                 pipeline_mode=pl.Buffered(1))
                    for p in flat_params]
        return [pl.BlockSpec(p.shape, lambda i: (0, 0)) for p in flat_params]

    def run(pin):
        return pl.pallas_call(
            _critic_mlp_kernel,
            out_shape=jax.ShapeDtypeStruct((b_pad, 1), jnp.float32),
            grid=(num_tiles,),
            in_specs=[x_spec] + param_specs(pin),
            out_specs=pl.BlockSpec((tb, 1), lambda i: (i, 0)),
            compiler_params=pltpu.CompilerParams(
                dimension_semantics=("parallel",),      # megacore split on v7x
                vmem_limit_bytes=vmem_limit),
        )(x, *flat_params)

    pin_options = (True, False) if hasattr(pl, "Buffered") else (False,)
    out, last_err = None, None
    for pin in pin_options:
        try:
            out = run(pin)
            break
        except Exception as e:          # fall back to default double buffering
            last_err = e
    if out is None:
        raise last_err

    return out[:batch]                  # drop padded rows -> (B, 1)


def init_params(key, max_length, input_dim):
    """Deterministic init matching CriticNetwork2's layer shapes.
    Weights stored as (in, out); PyTorch stores (out, in) and transposes."""
    dims = [input_dim * max_length] + HIDDEN_DIMS + [1]
    params = []
    for i in range(len(dims) - 1):
        fan_in, fan_out = dims[i], dims[i + 1]
        key, wk, bk = jax.random.split(key, 3)
        bound = 1.0 / jnp.sqrt(fan_in)
        w = jax.random.uniform(wk, (fan_in, fan_out), jnp.float32, -bound, bound)
        b = jax.random.uniform(bk, (fan_out,), jnp.float32, -bound, bound)
        params.append((w, b))
    return params


def critic_reference(external, params):
    """Pure-JAX f32 reference (matches the PyTorch module's math)."""
    h = external.reshape(external.shape[0], -1)
    for i, (w, b) in enumerate(params):
        h = h @ w + b
        if i < len(params) - 1:
            h = jnp.maximum(h, 0.0)
    return h


def critic_reference_mimic(external, params):
    """Reference mimicking the kernel's dtype path (bf16 MXU inputs with f32
    accumulation, f32 lane-reduce head) for a tight numerical check."""
    h = external.reshape(external.shape[0], -1).astype(jnp.float32)
    n = len(params)
    for i, (w, b) in enumerate(params):
        if i < n - 1:
            h = jnp.dot(h.astype(jnp.bfloat16), w.astype(jnp.bfloat16),
                        preferred_element_type=jnp.float32) + b
            h = jnp.maximum(h, 0.0)
        else:
            h = jnp.sum(h * w[:, 0][None, :], axis=-1, keepdims=True) + b
    return h


if __name__ == "__main__":
    key = jax.random.PRNGKey(0)
    batch, max_length, input_dim = 8, 8, 4      # flattened feature dim = 32

    key, xk = jax.random.split(key)
    external = jax.random.normal(xk, (batch, max_length, input_dim), jnp.float32)
    params = init_params(key, max_length, input_dim)

    out = jax.block_until_ready(critic_forward(external, params))

    ref_mimic = critic_reference_mimic(external, params)
    ref_f32 = critic_reference(external, params)

    assert out.shape == (batch, 1), out.shape
    assert jnp.allclose(out, ref_mimic, atol=1e-2, rtol=1e-2), (out, ref_mimic)
    assert jnp.allclose(out, ref_f32, atol=5e-2, rtol=5e-2), (out, ref_f32)

    print("KERNEL_OK")
</pallas_src>

<mosaic_0001>
module attributes {stable_mosaic.version = 11 : i64} {
  func.func @_critic_mlp_kernel(%arg0: i32, %arg1: memref<8x32xf32, #tpu.memory_space<vmem>>, %arg2: memref<32x256xbf16, #tpu.memory_space<vmem>>, %arg3: memref<1x256xf32, #tpu.memory_space<vmem>>, %arg4: memref<256x128xbf16, #tpu.memory_space<vmem>>, %arg5: memref<1x128xf32, #tpu.memory_space<vmem>>, %arg6: memref<128x128xbf16, #tpu.memory_space<vmem>>, %arg7: memref<1x128xf32, #tpu.memory_space<vmem>>, %arg8: memref<128x128xbf16, #tpu.memory_space<vmem>>, %arg9: memref<1x128xf32, #tpu.memory_space<vmem>>, %arg10: memref<128x128xbf16, #tpu.memory_space<vmem>>, %arg11: memref<1x128xf32, #tpu.memory_space<vmem>>, %arg12: memref<1x128xf32, #tpu.memory_space<vmem>>, %arg13: memref<1x1xf32, #tpu.memory_space<vmem>>, %arg14: memref<8x1xf32, #tpu.memory_space<vmem>>) attributes {dimension_semantics = [#tpu.dimension_semantics<parallel>], iteration_bounds = array<i64: 1>, scalar_prefetch = 0 : i64, scratch_operands = 0 : i64, tpu.core_type = #tpu.core_type<tc>, window_params = [{transform_indices = @transform_0, window_bounds = array<i64: 8, 32>}, {pipeline_mode = #tpu.pipeline_mode<synchronous>, transform_indices = @transform_1, window_bounds = array<i64: 32, 256>}, {pipeline_mode = #tpu.pipeline_mode<synchronous>, transform_indices = @transform_2, window_bounds = array<i64: 1, 256>}, {pipeline_mode = #tpu.pipeline_mode<synchronous>, transform_indices = @transform_3, window_bounds = array<i64: 256, 128>}, {pipeline_mode = #tpu.pipeline_mode<synchronous>, transform_indices = @transform_4, window_bounds = array<i64: 1, 128>}, {pipeline_mode = #tpu.pipeline_mode<synchronous>, transform_indices = @transform_5, window_bounds = array<i64: 128, 128>}, {pipeline_mode = #tpu.pipeline_mode<synchronous>, transform_indices = @transform_6, window_bounds = array<i64: 1, 128>}, {pipeline_mode = #tpu.pipeline_mode<synchronous>, transform_indices = @transform_7, window_bounds = array<i64: 128, 128>}, {pipeline_mode = #tpu.pipeline_mode<synchronous>, transform_indices = @transform_8, window_bounds = array<i64: 1, 128>}, {pipeline_mode = #tpu.pipeline_mode<synchronous>, transform_indices = @transform_9, window_bounds = array<i64: 128, 128>}, {pipeline_mode = #tpu.pipeline_mode<synchronous>, transform_indices = @transform_10, window_bounds = array<i64: 1, 128>}, {pipeline_mode = #tpu.pipeline_mode<synchronous>, transform_indices = @transform_11, window_bounds = array<i64: 1, 128>}, {pipeline_mode = #tpu.pipeline_mode<synchronous>, transform_indices = @transform_12, window_bounds = array<i64: 1, 1>}, {transform_indices = @transform_13, window_bounds = array<i64: 8, 1>}]} {
    %c0 = arith.constant 0 : index
    %c0_0 = arith.constant 0 : index
    %0 = vector.load %arg1[%c0, %c0_0] : memref<8x32xf32, #tpu.memory_space<vmem>>, vector<8x32xf32>
    %1 = arith.truncf %0 : vector<8x32xf32> to vector<8x32xbf16>
    %c0_1 = arith.constant 0 : index
    %c0_2 = arith.constant 0 : index
    %2 = vector.load %arg2[%c0_1, %c0_2] : memref<32x256xbf16, #tpu.memory_space<vmem>>, vector<32x256xbf16>
    %c0_3 = arith.constant 0 : index
    %c0_4 = arith.constant 0 : index
    %3 = vector.load %arg3[%c0_3, %c0_4] : memref<1x256xf32, #tpu.memory_space<vmem>>, vector<1x256xf32>
    %cst = arith.constant dense<0.000000e+00> : vector<8x256xf32>
    %4 = tpu.matmul %1, %2, %cst {dimension_numbers = #tpu.dot_dimension_numbers<[1], [0], [0], [1], [0, 0, 1, 1], [], []>} : vector<8x32xbf16>, vector<32x256xbf16>, vector<8x256xf32> -> vector<8x256xf32>
    %5 = vector.broadcast %3 : vector<1x256xf32> to vector<8x256xf32>
    %6 = arith.addf %4, %5 : vector<8x256xf32>
    %cst_5 = arith.constant 0.000000e+00 : f32
    %7 = vector.broadcast %cst_5 : f32 to vector<8x256xf32>
    %8 = arith.maximumf %6, %7 : vector<8x256xf32>
    %9 = arith.truncf %8 : vector<8x256xf32> to vector<8x256xbf16>
    %c0_6 = arith.constant 0 : index
    %c0_7 = arith.constant 0 : index
    %10 = vector.load %arg4[%c0_6, %c0_7] : memref<256x128xbf16, #tpu.memory_space<vmem>>, vector<256x128xbf16>
    %c0_8 = arith.constant 0 : index
    %c0_9 = arith.constant 0 : index
    %11 = vector.load %arg5[%c0_8, %c0_9] : memref<1x128xf32, #tpu.memory_space<vmem>>, vector<1x128xf32>
    %cst_10 = arith.constant dense<0.000000e+00> : vector<8x128xf32>
    %12 = tpu.matmul %9, %10, %cst_10 {dimension_numbers = #tpu.dot_dimension_numbers<[1], [0], [0], [1], [0, 0, 1, 1], [], []>} : vector<8x256xbf16>, vector<256x128xbf16>, vector<8x128xf32> -> vector<8x128xf32>
    %13 = vector.broadcast %11 : vector<1x128xf32> to vector<8x128xf32>
    %14 = arith.addf %12, %13 : vector<8x128xf32>
    %cst_11 = arith.constant 0.000000e+00 : f32
    %15 = vector.broadcast %cst_11 : f32 to vector<8x128xf32>
    %16 = arith.maximumf %14, %15 : vector<8x128xf32>
    %17 = arith.truncf %16 : vector<8x128xf32> to vector<8x128xbf16>
    %c0_12 = arith.constant 0 : index
    %c0_13 = arith.constant 0 : index
    %18 = vector.load %arg6[%c0_12, %c0_13] : memref<128x128xbf16, #tpu.memory_space<vmem>>, vector<128x128xbf16>
    %c0_14 = arith.constant 0 : index
    %c0_15 = arith.constant 0 : index
    %19 = vector.load %arg7[%c0_14, %c0_15] : memref<1x128xf32, #tpu.memory_space<vmem>>, vector<1x128xf32>
    %cst_16 = arith.constant dense<0.000000e+00> : vector<8x128xf32>
    %20 = tpu.matmul %17, %18, %cst_16 {dimension_numbers = #tpu.dot_dimension_numbers<[1], [0], [0], [1], [0, 0, 1, 1], [], []>} : vector<8x128xbf16>, vector<128x128xbf16>, vector<8x128xf32> -> vector<8x128xf32>
    %21 = vector.broadcast %19 : vector<1x128xf32> to vector<8x128xf32>
    %22 = arith.addf %20, %21 : vector<8x128xf32>
    %cst_17 = arith.constant 0.000000e+00 : f32
    %23 = vector.broadcast %cst_17 : f32 to vector<8x128xf32>
    %24 = arith.maximumf %22, %23 : vector<8x128xf32>
    %25 = arith.truncf %24 : vector<8x128xf32> to vector<8x128xbf16>
    %c0_18 = arith.constant 0 : index
    %c0_19 = arith.constant 0 : index
    %26 = vector.load %arg8[%c0_18, %c0_19] : memref<128x128xbf16, #tpu.memory_space<vmem>>, vector<128x128xbf16>
    %c0_20 = arith.constant 0 : index
    %c0_21 = arith.constant 0 : index
    %27 = vector.load %arg9[%c0_20, %c0_21] : memref<1x128xf32, #tpu.memory_space<vmem>>, vector<1x128xf32>
    %cst_22 = arith.constant dense<0.000000e+00> : vector<8x128xf32>
    %28 = tpu.matmul %25, %26, %cst_22 {dimension_numbers = #tpu.dot_dimension_numbers<[1], [0], [0], [1], [0, 0, 1, 1], [], []>} : vector<8x128xbf16>, vector<128x128xbf16>, vector<8x128xf32> -> vector<8x128xf32>
    %29 = vector.broadcast %27 : vector<1x128xf32> to vector<8x128xf32>
    %30 = arith.addf %28, %29 : vector<8x128xf32>
    %cst_23 = arith.constant 0.000000e+00 : f32
    %31 = vector.broadcast %cst_23 : f32 to vector<8x128xf32>
    %32 = arith.maximumf %30, %31 : vector<8x128xf32>
    %33 = arith.truncf %32 : vector<8x128xf32> to vector<8x128xbf16>
    %c0_24 = arith.constant 0 : index
    %c0_25 = arith.constant 0 : index
    %34 = vector.load %arg10[%c0_24, %c0_25] : memref<128x128xbf16, #tpu.memory_space<vmem>>, vector<128x128xbf16>
    %c0_26 = arith.constant 0 : index
    %c0_27 = arith.constant 0 : index
    %35 = vector.load %arg11[%c0_26, %c0_27] : memref<1x128xf32, #tpu.memory_space<vmem>>, vector<1x128xf32>
    %cst_28 = arith.constant dense<0.000000e+00> : vector<8x128xf32>
    %36 = tpu.matmul %33, %34, %cst_28 {dimension_numbers = #tpu.dot_dimension_numbers<[1], [0], [0], [1], [0, 0, 1, 1], [], []>} : vector<8x128xbf16>, vector<128x128xbf16>, vector<8x128xf32> -> vector<8x128xf32>
    %37 = vector.broadcast %35 : vector<1x128xf32> to vector<8x128xf32>
    %38 = arith.addf %36, %37 : vector<8x128xf32>
    %cst_29 = arith.constant 0.000000e+00 : f32
    %39 = vector.broadcast %cst_29 : f32 to vector<8x128xf32>
    %40 = arith.maximumf %38, %39 : vector<8x128xf32>
    %c0_30 = arith.constant 0 : index
    %c0_31 = arith.constant 0 : index
    %41 = vector.load %arg12[%c0_30, %c0_31] : memref<1x128xf32, #tpu.memory_space<vmem>>, vector<1x128xf32>
    %c0_32 = arith.constant 0 : index
    %c0_33 = arith.constant 0 : index
    %42 = vector.load %arg13[%c0_32, %c0_33] : memref<1x1xf32, #tpu.memory_space<vmem>>, vector<1x1xf32>
    %43 = vector.broadcast %41 : vector<1x128xf32> to vector<8x128xf32>
    %44 = arith.mulf %40, %43 : vector<8x128xf32>
    %cst_34 = arith.constant dense<0.000000e+00> : vector<8xf32>
    %45 = vector.multi_reduction <add>, %44, %cst_34 [1] : vector<8x128xf32> to vector<8xf32>
    %46 = vector.shape_cast %45 : vector<8xf32> to vector<8x1xf32>
    %47 = vector.broadcast %42 : vector<1x1xf32> to vector<8x1xf32>
    %48 = arith.addf %46, %47 : vector<8x1xf32>
    %c0_35 = arith.constant 0 : index
    %c0_36 = arith.constant 0 : index
    %49 = vector.load %arg14[%c0_35, %c0_36] : memref<8x1xf32, #tpu.memory_space<vmem>>, vector<8x1xf32>
    tpu.vector_store %arg14[%c0_35, %c0_36], %48 {strides = array<i32>} : memref<8x1xf32, #tpu.memory_space<vmem>>, vector<8x1xf32>,
    return
  }
  func.func @transform_0(%arg0: i32) -> (i32, i32) {
    %c0_i32 = arith.constant 0 : i32
    %c0_i32_0 = arith.constant 0 : i32
    return %arg0, %c0_i32 : i32, i32
  }
  func.func @transform_1(%arg0: i32) -> (i32, i32) {
    %c0_i32 = arith.constant 0 : i32
    %c0_i32_0 = arith.constant 0 : i32
    %c0_i32_1 = arith.constant 0 : i32
    return %c0_i32, %c0_i32_0 : i32, i32
  }
  func.func @transform_2(%arg0: i32) -> (i32, i32) {
    %c0_i32 = arith.constant 0 : i32
    %c0_i32_0 = arith.constant 0 : i32
    %c0_i32_1 = arith.constant 0 : i32
    return %c0_i32, %c0_i32_0 : i32, i32
  }
  func.func @transform_3(%arg0: i32) -> (i32, i32) {
    %c0_i32 = arith.constant 0 : i32
    %c0_i32_0 = arith.constant 0 : i32
    %c0_i32_1 = arith.constant 0 : i32
    return %c0_i32, %c0_i32_0 : i32, i32
  }
  func.func @transform_4(%arg0: i32) -> (i32, i32) {
    %c0_i32 = arith.constant 0 : i32
    %c0_i32_0 = arith.constant 0 : i32
    %c0_i32_1 = arith.constant 0 : i32
    return %c0_i32, %c0_i32_0 : i32, i32
  }
  func.func @transform_5(%arg0: i32) -> (i32, i32) {
    %c0_i32 = arith.constant 0 : i32
    %c0_i32_0 = arith.constant 0 : i32
    %c0_i32_1 = arith.constant 0 : i32
    return %c0_i32, %c0_i32_0 : i32, i32
  }
  func.func @transform_6(%arg0: i32) -> (i32, i32) {
    %c0_i32 = arith.constant 0 : i32
    %c0_i32_0 = arith.constant 0 : i32
    %c0_i32_1 = arith.constant 0 : i32
    return %c0_i32, %c0_i32_0 : i32, i32
  }
  func.func @transform_7(%arg0: i32) -> (i32, i32) {
    %c0_i32 = arith.constant 0 : i32
    %c0_i32_0 = arith.constant 0 : i32
    %c0_i32_1 = arith.constant 0 : i32
    return %c0_i32, %c0_i32_0 : i32, i32
  }
  func.func @transform_8(%arg0: i32) -> (i32, i32) {
    %c0_i32 = arith.constant 0 : i32
    %c0_i32_0 = arith.constant 0 : i32
    %c0_i32_1 = arith.constant 0 : i32
    return %c0_i32, %c0_i32_0 : i32, i32
  }
  func.func @transform_9(%arg0: i32) -> (i32, i32) {
    %c0_i32 = arith.constant 0 : i32
    %c0_i32_0 = arith.constant 0 : i32
    %c0_i32_1 = arith.constant 0 : i32
    return %c0_i32, %c0_i32_0 : i32, i32
  }
  func.func @transform_10(%arg0: i32) -> (i32, i32) {
    %c0_i32 = arith.constant 0 : i32
    %c0_i32_0 = arith.constant 0 : i32
    %c0_i32_1 = arith.constant 0 : i32
    return %c0_i32, %c0_i32_0 : i32, i32
  }
  func.func @transform_11(%arg0: i32) -> (i32, i32) {
    %c0_i32 = arith.constant 0 : i32
    %c0_i32_0 = arith.constant 0 : i32
    %c0_i32_1 = arith.constant 0 : i32
    return %c0_i32, %c0_i32_0 : i32, i32
  }
  func.func @transform_12(%arg0: i32) -> (i32, i32) {
    %c0_i32 = arith.constant 0 : i32
    %c0_i32_0 = arith.constant 0 : i32
    %c0_i32_1 = arith.constant 0 : i32
    return %c0_i32, %c0_i32_0 : i32, i32
  }
  func.func @transform_13(%arg0: i32) -> (i32, i32) {
    %c0_i32 = arith.constant 0 : i32
    %c0_i32_0 = arith.constant 0 : i32
    return %arg0, %c0_i32 : i32, i32
  }
}

module attributes {stable_mosaic.version = 11 : i64} {
  func.func @_critic_mlp_kernel(%arg0: i32, %arg1: memref<8x32xf32, #tpu.memory_space<vmem>>, %arg2: memref<32x256xbf16, #tpu.memory_space<vmem>>, %arg3: memref<1x256xf32, #tpu.memory_space<vmem>>, %arg4: memref<256x128xbf16, #tpu.memory_space<vmem>>, %arg5: memref<1x128xf32, #tpu.memory_space<vmem>>, %arg6: memref<128x128xbf16, #tpu.memory_space<vmem>>, %arg7: memref<1x128xf32, #tpu.memory_space<vmem>>, %arg8: memref<128x128xbf16, #tpu.memory_space<vmem>>, %arg9: memref<1x128xf32, #tpu.memory_space<vmem>>, %arg10: memref<128x128xbf16, #tpu.memory_space<vmem>>, %arg11: memref<1x128xf32, #tpu.memory_space<vmem>>, %arg12: memref<1x128xf32, #tpu.memory_space<vmem>>, %arg13: memref<1x1xf32, #tpu.memory_space<vmem>>, %arg14: memref<8x1xf32, #tpu.memory_space<vmem>>) attributes {dimension_semantics = [#tpu.dimension_semantics<parallel>], iteration_bounds = array<i64: 1>, scalar_prefetch = 0 : i64, scratch_operands = 0 : i64, tpu.core_type = #tpu.core_type<tc>, window_params = [{transform_indices = @transform_0, window_bounds = array<i64: 8, 32>}, {pipeline_mode = #tpu.pipeline_mode<synchronous>, transform_indices = @transform_1, window_bounds = array<i64: 32, 256>}, {pipeline_mode = #tpu.pipeline_mode<synchronous>, transform_indices = @transform_2, window_bounds = array<i64: 1, 256>}, {pipeline_mode = #tpu.pipeline_mode<synchronous>, transform_indices = @transform_3, window_bounds = array<i64: 256, 128>}, {pipeline_mode = #tpu.pipeline_mode<synchronous>, transform_indices = @transform_4, window_bounds = array<i64: 1, 128>}, {pipeline_mode = #tpu.pipeline_mode<synchronous>, transform_indices = @transform_5, window_bounds = array<i64: 128, 128>}, {pipeline_mode = #tpu.pipeline_mode<synchronous>, transform_indices = @transform_6, window_bounds = array<i64: 1, 128>}, {pipeline_mode = #tpu.pipeline_mode<synchronous>, transform_indices = @transform_7, window_bounds = array<i64: 128, 128>}, {pipeline_mode = #tpu.pipeline_mode<synchronous>, transform_indices = @transform_8, window_bounds = array<i64: 1, 128>}, {pipeline_mode = #tpu.pipeline_mode<synchronous>, transform_indices = @transform_9, window_bounds = array<i64: 128, 128>}, {pipeline_mode = #tpu.pipeline_mode<synchronous>, transform_indices = @transform_10, window_bounds = array<i64: 1, 128>}, {pipeline_mode = #tpu.pipeline_mode<synchronous>, transform_indices = @transform_11, window_bounds = array<i64: 1, 128>}, {pipeline_mode = #tpu.pipeline_mode<synchronous>, transform_indices = @transform_12, window_bounds = array<i64: 1, 1>}, {transform_indices = @transform_13, window_bounds = array<i64: 8, 1>}]} {
    %c0 = arith.constant 0 : index
    %c0_0 = arith.constant 0 : index
    %0 = vector.load %arg1[%c0, %c0_0] : memref<8x32xf32, #tpu.memory_space<vmem>>, vector<8x32xf32>
    %1 = arith.truncf %0 : vector<8x32xf32> to vector<8x32xbf16>
    %c0_1 = arith.constant 0 : index
    %c0_2 = arith.constant 0 : index
    %2 = vector.load %arg2[%c0_1, %c0_2] : memref<32x256xbf16, #tpu.memory_space<vmem>>, vector<32x256xbf16>
    %c0_3 = arith.constant 0 : index
    %c0_4 = arith.constant 0 : index
    %3 = vector.load %arg3[%c0_3, %c0_4] : memref<1x256xf32, #tpu.memory_space<vmem>>, vector<1x256xf32>
    %cst = arith.constant dense<0.000000e+00> : vector<8x256xf32>
    %4 = tpu.matmul %1, %2, %cst {dimension_numbers = #tpu.dot_dimension_numbers<[1], [0], [0], [1], [0, 0, 1, 1], [], []>} : vector<8x32xbf16>, vector<32x256xbf16>, vector<8x256xf32> -> vector<8x256xf32>
    %5 = vector.broadcast %3 : vector<1x256xf32> to vector<8x256xf32>
    %6 = arith.addf %4, %5 : vector<8x256xf32>
    %cst_5 = arith.constant 0.000000e+00 : f32
    %7 = vector.broadcast %cst_5 : f32 to vector<8x256xf32>
    %8 = arith.maximumf %6, %7 : vector<8x256xf32>
    %9 = arith.truncf %8 : vector<8x256xf32> to vector<8x256xbf16>
    %c0_6 = arith.constant 0 : index
    %c0_7 = arith.constant 0 : index
    %10 = vector.load %arg4[%c0_6, %c0_7] : memref<256x128xbf16, #tpu.memory_space<vmem>>, vector<256x128xbf16>
    %c0_8 = arith.constant 0 : index
    %c0_9 = arith.constant 0 : index
    %11 = vector.load %arg5[%c0_8, %c0_9] : memref<1x128xf32, #tpu.memory_space<vmem>>, vector<1x128xf32>
    %cst_10 = arith.constant dense<0.000000e+00> : vector<8x128xf32>
    %12 = tpu.matmul %9, %10, %cst_10 {dimension_numbers = #tpu.dot_dimension_numbers<[1], [0], [0], [1], [0, 0, 1, 1], [], []>} : vector<8x256xbf16>, vector<256x128xbf16>, vector<8x128xf32> -> vector<8x128xf32>
    %13 = vector.broadcast %11 : vector<1x128xf32> to vector<8x128xf32>
    %14 = arith.addf %12, %13 : vector<8x128xf32>
    %cst_11 = arith.constant 0.000000e+00 : f32
    %15 = vector.broadcast %cst_11 : f32 to vector<8x128xf32>
    %16 = arith.maximumf %14, %15 : vector<8x128xf32>
    %17 = arith.truncf %16 : vector<8x128xf32> to vector<8x128xbf16>
    %c0_12 = arith.constant 0 : index
    %c0_13 = arith.constant 0 : index
    %18 = vector.load %arg6[%c0_12, %c0_13] : memref<128x128xbf16, #tpu.memory_space<vmem>>, vector<128x128xbf16>
    %c0_14 = arith.constant 0 : index
    %c0_15 = arith.constant 0 : index
    %19 = vector.load %arg7[%c0_14, %c0_15] : memref<1x128xf32, #tpu.memory_space<vmem>>, vector<1x128xf32>
    %cst_16 = arith.constant dense<0.000000e+00> : vector<8x128xf32>
    %20 = tpu.matmul %17, %18, %cst_16 {dimension_numbers = #tpu.dot_dimension_numbers<[1], [0], [0], [1], [0, 0, 1, 1], [], []>} : vector<8x128xbf16>, vector<128x128xbf16>, vector<8x128xf32> -> vector<8x128xf32>
    %21 = vector.broadcast %19 : vector<1x128xf32> to vector<8x128xf32>
    %22 = arith.addf %20, %21 : vector<8x128xf32>
    %cst_17 = arith.constant 0.000000e+00 : f32
    %23 = vector.broadcast %cst_17 : f32 to vector<8x128xf32>
    %24 = arith.maximumf %22, %23 : vector<8x128xf32>
    %25 = arith.truncf %24 : vector<8x128xf32> to vector<8x128xbf16>
    %c0_18 = arith.constant 0 : index
    %c0_19 = arith.constant 0 : index
    %26 = vector.load %arg8[%c0_18, %c0_19] : memref<128x128xbf16, #tpu.memory_space<vmem>>, vector<128x128xbf16>
    %c0_20 = arith.constant 0 : index
    %c0_21 = arith.constant 0 : index
    %27 = vector.load %arg9[%c0_20, %c0_21] : memref<1x128xf32, #tpu.memory_space<vmem>>, vector<1x128xf32>
    %cst_22 = arith.constant dense<0.000000e+00> : vector<8x128xf32>
    %28 = tpu.matmul %25, %26, %cst_22 {dimension_numbers = #tpu.dot_dimension_numbers<[1], [0], [0], [1], [0, 0, 1, 1], [], []>} : vector<8x128xbf16>, vector<128x128xbf16>, vector<8x128xf32> -> vector<8x128xf32>
    %29 = vector.broadcast %27 : vector<1x128xf32> to vector<8x128xf32>
    %30 = arith.addf %28, %29 : vector<8x128xf32>
    %cst_23 = arith.constant 0.000000e+00 : f32
    %31 = vector.broadcast %cst_23 : f32 to vector<8x128xf32>
    %32 = arith.maximumf %30, %31 : vector<8x128xf32>
    %33 = arith.truncf %32 : vector<8x128xf32> to vector<8x128xbf16>
    %c0_24 = arith.constant 0 : index
    %c0_25 = arith.constant 0 : index
    %34 = vector.load %arg10[%c0_24, %c0_25] : memref<128x128xbf16, #tpu.memory_space<vmem>>, vector<128x128xbf16>
    %c0_26 = arith.constant 0 : index
    %c0_27 = arith.constant 0 : index
    %35 = vector.load %arg11[%c0_26, %c0_27] : memref<1x128xf32, #tpu.memory_space<vmem>>, vector<1x128xf32>
    %cst_28 = arith.constant dense<0.000000e+00> : vector<8x128xf32>
    %36 = tpu.matmul %33, %34, %cst_28 {dimension_numbers = #tpu.dot_dimension_numbers<[1], [0], [0], [1], [0, 0, 1, 1], [], []>} : vector<8x128xbf16>, vector<128x128xbf16>, vector<8x128xf32> -> vector<8x128xf32>
    %37 = vector.broadcast %35 : vector<1x128xf32> to vector<8x128xf32>
    %38 = arith.addf %36, %37 : vector<8x128xf32>
    %cst_29 = arith.constant 0.000000e+00 : f32
    %39 = vector.broadcast %cst_29 : f32 to vector<8x128xf32>
    %40 = arith.maximumf %38, %39 : vector<8x128xf32>
    %c0_30 = arith.constant 0 : index
    %c0_31 = arith.constant 0 : index
    %41 = vector.load %arg12[%c0_30, %c0_31] : memref<1x128xf32, #tpu.memory_space<vmem>>, vector<1x128xf32>
    %c0_32 = arith.constant 0 : index
    %c0_33 = arith.constant 0 : index
    %42 = vector.load %arg13[%c0_32, %c0_33] : memref<1x1xf32, #tpu.memory_space<vmem>>, vector<1x1xf32>
    %43 = vector.broadcast %41 : vector<1x128xf32> to vector<8x128xf32>
    %44 = arith.mulf %40, %43 : vector<8x128xf32>
    %cst_34 = arith.constant dense<0.000000e+00> : vector<8xf32>
    %45 = vector.multi_reduction <add>, %44, %cst_34 [1] : vector<8x128xf32> to vector<8xf32>
    %46 = vector.shape_cast %45 : vector<8xf32> to vector<8x1xf32>
    %47 = vector.broadcast %42 : vector<1x1xf32> to vector<8x1xf32>
    %48 = arith.addf %46, %47 : vector<8x1xf32>
    %c0_35 = arith.constant 0 : index
    %c0_36 = arith.constant 0 : index
    %49 = vector.load %arg14[%c0_35, %c0_36] : memref<8x1xf32, #tpu.memory_space<vmem>>, vector<8x1xf32>
    tpu.vector_store %arg14[%c0_35, %c0_36], %48 {strides = array<i32>} : memref<8x1xf32, #tpu.memory_space<vmem>>, vector<8x1xf32>,
    return
  }
  func.func @transform_0(%arg0: i32) -> (i32, i32) {
    %c0_i32 = arith.constant 0 : i32
    %c0_i32_0 = arith.constant 0 : i32
    return %arg0, %c0_i32 : i32, i32
  }
  func.func @transform_1(%arg0: i32) -> (i32, i32) {
    %c0_i32 = arith.constant 0 : i32
    %c0_i32_0 = arith.constant 0 : i32
    %c0_i32_1 = arith.constant 0 : i32
    return %c0_i32, %c0_i32_0 : i32, i32
  }
  func.func @transform_2(%arg0: i32) -> (i32, i32) {
    %c0_i32 = arith.constant 0 : i32
    %c0_i32_0 = arith.constant 0 : i32
    %c0_i32_1 = arith.constant 0 : i32
    return %c0_i32, %c0_i32_0 : i32, i32
  }
  func.func @transform_3(%arg0: i32) -> (i32, i32) {
    %c0_i32 = arith.constant 0 : i32
    %c0_i32_0 = arith.constant 0 : i32
    %c0_i32_1 = arith.constant 0 : i32
    return %c0_i32, %c0_i32_0 : i32, i32
  }
  func.func @transform_4(%arg0: i32) -> (i32, i32) {
    %c0_i32 = arith.constant 0 : i32
    %c0_i32_0 = arith.constant 0 : i32
    %c0_i32_1 = arith.constant 0 : i32
    return %c0_i32, %c0_i32_0 : i32, i32
  }
  func.func @transform_5(%arg0: i32) -> (i32, i32) {
    %c0_i32 = arith.constant 0 : i32
    %c0_i32_0 = arith.constant 0 : i32
    %c0_i32_1 = arith.constant 0 : i32
    return %c0_i32, %c0_i32_0 : i32, i32
  }
  func.func @transform_6(%arg0: i32) -> (i32, i32) {
    %c0_i32 = arith.constant 0 : i32
    %c0_i32_0 = arith.constant 0 : i32
    %c0_i32_1 = arith.constant 0 : i32
    return %c0_i32, %c0_i32_0 : i32, i32
  }
  func.func @transform_7(%arg0: i32) -> (i32, i32) {
    %c0_i32 = arith.constant 0 : i32
    %c0_i32_0 = arith.constant 0 : i32
    %c0_i32_1 = arith.constant 0 : i32
    return %c0_i32, %c0_i32_0 : i32, i32
  }
  func.func @transform_8(%arg0: i32) -> (i32, i32) {
    %c0_i32 = arith.constant 0 : i32
    %c0_i32_0 = arith.constant 0 : i32
    %c0_i32_1 = arith.constant 0 : i32
    return %c0_i32, %c0_i32_0 : i32, i32
  }
  func.func @transform_9(%arg0: i32) -> (i32, i32) {
    %c0_i32 = arith.constant 0 : i32
    %c0_i32_0 = arith.constant 0 : i32
    %c0_i32_1 = arith.constant 0 : i32
    return %c0_i32, %c0_i32_0 : i32, i32
  }
  func.func @transform_10(%arg0: i32) -> (i32, i32) {
    %c0_i32 = arith.constant 0 : i32
    %c0_i32_0 = arith.constant 0 : i32
    %c0_i32_1 = arith.constant 0 : i32
    return %c0_i32, %c0_i32_0 : i32, i32
  }
  func.func @transform_11(%arg0: i32) -> (i32, i32) {
    %c0_i32 = arith.constant 0 : i32
    %c0_i32_0 = arith.constant 0 : i32
    %c0_i32_1 = arith.constant 0 : i32
    return %c0_i32, %c0_i32_0 : i32, i32
  }
  func.func @transform_12(%arg0: i32) -> (i32, i32) {
    %c0_i32 = arith.constant 0 : i32
    %c0_i32_0 = arith.constant 0 : i32
    %c0_i32_1 = arith.constant 0 : i32
    return %c0_i32, %c0_i32_0 : i32, i32
  }
  func.func @transform_13(%arg0: i32) -> (i32, i32) {
    %c0_i32 = arith.constant 0 : i32
    %c0_i32_0 = arith.constant 0 : i32
    return %arg0, %c0_i32 : i32, i32
  }
}

</mosaic_0001>

<bundles_post_ra>
// kernel: tpu_custom_call.1
= control target key start
LH: loop header
LB: loop body
LE: loop exit
PB: predicated region body
PF: predicated region fallthrough
CT: control target
= control target key end

     0   :  { %s1337_s0 = inlined_call_operand.hbm [shape: f32[8,32], index: 0, kind: input, shape index: {}]   ;;  %s1338_s1 = inlined_call_operand.hbm [shape: bf16[32,256], index: 1, kind: input, shape index: {}]   ;;  %s1339_s2 = inlined_call_operand.vmem [shape: f32[1,256], index: 2, kind: input, shape index: {}]   ;;  %s1340_s3 = inlined_call_operand.hbm [shape: bf16[256,128], index: 3, kind: input, shape index: {}]   ;;  %s1341_s4 = inlined_call_operand.vmem [shape: f32[1,128], index: 4, kind: input, shape index: {}]   ;;  %s1342_s5 = inlined_call_operand.hbm [shape: bf16[128,128], index: 5, kind: input, shape index: {}]   ;;  %s1343_s6 = inlined_call_operand.vmem [shape: f32[1,128], index: 6, kind: input, shape index: {}]   ;;  %s1344_s7 = inlined_call_operand.hbm [shape: bf16[128,128], index: 7, kind: input, shape index: {}]   ;;  %s1345_s8 = inlined_call_operand.vmem [shape: f32[1,128], index: 8, kind: input, shape index: {}]   ;;  %s1346_s9 = inlined_call_operand.hbm [shape: bf16[128,128], index: 9, kind: input, shape index: {}]   ;;  %s1347_s10 = inlined_call_operand.vmem [shape: f32[1,128], index: 10, kind: input, shape index: {}]   ;;  %s1348_s11 = inlined_call_operand.vmem [shape: f32[1,128], index: 11, kind: input, shape index: {}]   ;;  %s1349_s12 = inlined_call_operand.<no memory space> [shape: f32[1,1], index: 12, kind: input, shape index: {}]   ;;  %s1350_s13 = inlined_call_operand.vmem [shape: f32[8,1], index: 13, kind: output, shape index: {}]  }
   0x1   :  { %v18_v0 = vstv %s1349_s12 }
   0x2   :  { %19 = vst [vmem:[#allocation2] sm:$0x1] %v18_v0 }
   0x3   :  { %20 = vsyncpa [#allocation4], 0 }
   0x4   :  { %21 = vsyncpa [#allocation6], 0 }
   0x5   :  { %22 = vsyncpa [#allocation9], 0 }
   0x6   :  { %23 = vsyncpa [#allocation12], 0  ;;  %s1116_s27 = smov [#allocation5]   ;;  %s976_s14 = scalar_lea.hbm %s1338_s1, 512 }
   0x7   :  { %s39_s28 = sshll.u32 %s1116_s27, 4  ;;  %p977_p0 = scmp.ne.s32.totalorder %s1338_s1, %s976_s14  ;;  %s40_s28 = int_to_ptr.vmem [resolvable:$true] %s39_s28 }
   0x8   :  { %p980_p1 = scmp.lt.u32.totalorder %s976_s14, %s1338_s1 }
   0xa   :  { %p982_p2 = pnand %p980_p1, %p977_p0 }
   0xc   :  { %985 = shalt.err (!%p982_p2)
}
   0xd   :  { %s986_s12 = scalar_lea.vmem %s40_s28, 512  ;;  %p991_p4 = scmp.lt.s32.totalorder %s40_s28, %s40_s28 }
   0xe   :  { %p987_p3 = scmp.ne.s32.totalorder %s40_s28, %s986_s12  ;;  %p992_p5 = scmp.lt.s32.totalorder %s986_s12, %s986_s12 }
  0x10   :  { %p993_p6 = por %p992_p5, %p991_p4 }
  0x12   :  { %p994_p7 = pnand %p993_p6, %p987_p3 }
  0x14   :  { %997 = shalt.err (!%p994_p7)
}
  0x15   :  { %s1117_s19 = smov 128   ;;  %s1118_s20 = smov 8  }
  0x16   :  { %45 = dma.hbm_to_vmem [thread:$0]  %s1338_s1, 512, %s40_s28, [#allocation6], %s1117_s19, %s1117_s19, %s1118_s20  }
  0x17   :  { %s1119_s23 = smov [#allocation8]   ;;  %s1120_s25 = smov [#allocation3]  }
  0x18   :  { %s67_s24 = sshll.u32 %s1119_s23, 4  ;;  %s30_s26 = sshll.u32 %s1120_s25, 4  ;;  %s68_s24 = int_to_ptr.vmem [resolvable:$true] %s67_s24  ;;  %s31_s26 = int_to_ptr.vmem [resolvable:$true] %s30_s26 }
  0x19   :  { %s998_s30 = scalar_lea.hbm %s1342_s5, 1024 }
  0x1a   :  { %p999_p8 = scmp.ne.s32.totalorder %s1342_s5, %s998_s30  ;;  %p1002_p9 = scmp.lt.u32.totalorder %s998_s30, %s1342_s5 }
  0x1c   :  { %p1004_p10 = pnand %p1002_p9, %p999_p8 }
  0x1e   :  { %1007 = shalt.err (!%p1004_p10)
}
  0x1f   :  { %s1008_s1 = scalar_lea.vmem %s68_s24, 1024  ;;  %p1013_p12 = scmp.lt.s32.totalorder %s68_s24, %s68_s24 }
  0x20   :  { %p1009_p11 = scmp.ne.s32.totalorder %s68_s24, %s1008_s1  ;;  %p1014_p13 = scmp.lt.s32.totalorder %s1008_s1, %s1008_s1 }
  0x22   :  { %p1015_p0 = por %p1014_p13, %p1013_p12 }
  0x24   :  { %p1016_p1 = pnand %p1015_p0, %p1009_p11 }
  0x26   :  { %1019 = shalt.err (!%p1016_p1)
}
  0x27   :  { %s1121_s28 = smov 64   ;;  %s1122_s18 = smov 4  }
  0x28   :  { %73 = dma.hbm_to_vmem [thread:$0]  %s1342_s5, 1024, %s68_s24, [#allocation9], %s1121_s28, %s1121_s28, %s1122_s18  }
  0x29   :  { %s1020_s22 = scalar_lea.hbm %s1337_s0, 128 }
  0x2a   :  { %p1021_p2 = scmp.ne.s32.totalorder %s1337_s0, %s1020_s22  ;;  %p1024_p3 = scmp.lt.u32.totalorder %s1020_s22, %s1337_s0 }
  0x2c   :  { %p1026_p4 = pnand %p1024_p3, %p1021_p2 }
  0x2e   :  { %1029 = shalt.err (!%p1026_p4)
}
  0x2f   :  { %s1030_s30 = scalar_lea.vmem %s31_s26, 128  ;;  %p1035_p6 = scmp.lt.s32.totalorder %s31_s26, %s31_s26 }
  0x30   :  { %p1031_p5 = scmp.ne.s32.totalorder %s31_s26, %s1030_s30  ;;  %p1036_p7 = scmp.lt.s32.totalorder %s1030_s30, %s1030_s30 }
  0x32   :  { %p1037_p8 = por %p1036_p7, %p1035_p6 }
  0x34   :  { %p1038_p9 = pnand %p1037_p8, %p1031_p5 }
  0x36   :  { %1041 = shalt.err (!%p1038_p9)
}
  0x37   :  { %33 = dma.hbm_to_vmem [thread:$0]  %s1337_s0, 128, %s31_s26, [#allocation4]  }
  0x38   :  { %s1123_s14 = smov [#allocation7]   ;;  %s1124_s16 = smov [#allocation10]  }
  0x39   :  { %s53_s15 = sshll.u32 %s1123_s14, 4  ;;  %s81_s17 = sshll.u32 %s1124_s16, 4  ;;  %s54_s15 = int_to_ptr.vmem [resolvable:$true] %s53_s15  ;;  %s82_s17 = int_to_ptr.vmem [resolvable:$true] %s81_s17 }
  0x3a   :  { %s1042_s19 = scalar_lea.hbm %s1340_s3, 2048 }
  0x3b   :  { %p1043_p10 = scmp.ne.s32.totalorder %s1340_s3, %s1042_s19  ;;  %p1046_p11 = scmp.lt.u32.totalorder %s1042_s19, %s1340_s3 }
  0x3d   :  { %p1048_p12 = pnand %p1046_p11, %p1043_p10 }
  0x3f   :  { %1051 = shalt.err (!%p1048_p12)
}
  0x40   :  { %s1052_s0 = scalar_lea.vmem %s54_s15, 2048  ;;  %p1057_p0 = scmp.lt.s32.totalorder %s54_s15, %s54_s15 }
  0x41   :  { %p1053_p13 = scmp.ne.s32.totalorder %s54_s15, %s1052_s0  ;;  %p1058_p1 = scmp.lt.s32.totalorder %s1052_s0, %s1052_s0 }
  0x43   :  { %p1059_p2 = por %p1058_p1, %p1057_p0 }
  0x45   :  { %p1060_p3 = pnand %p1059_p2, %p1053_p13 }
  0x47   :  { %1063 = shalt.err (!%p1060_p3)
}
  0x48   :  { %59 = dma.hbm_to_vmem [thread:$0]  %s1340_s3, 2048, %s54_s15, [#allocation6], %s1121_s28, %s1121_s28, %s1122_s18  }
  0x49   :  { %s1064_s30 = scalar_lea.hbm %s1344_s7, 1024 }
  0x4a   :  { %p1065_p4 = scmp.ne.s32.totalorder %s1344_s7, %s1064_s30  ;;  %p1068_p5 = scmp.lt.u32.totalorder %s1064_s30, %s1344_s7 }
  0x4c   :  { %p1070_p6 = pnand %p1068_p5, %p1065_p4 }
  0x4e   :  { %1073 = shalt.err (!%p1070_p6)
}
  0x4f   :  { %s1074_s1 = scalar_lea.vmem %s82_s17, 1024  ;;  %p1079_p8 = scmp.lt.s32.totalorder %s82_s17, %s82_s17 }
  0x50   :  { %p1075_p7 = scmp.ne.s32.totalorder %s82_s17, %s1074_s1  ;;  %p1080_p9 = scmp.lt.s32.totalorder %s1074_s1, %s1074_s1 }
  0x52   :  { %p1081_p10 = por %p1080_p9, %p1079_p8 }
  0x54   :  { %p1082_p11 = pnand %p1081_p10, %p1075_p7 }
  0x56   :  { %1085 = shalt.err (!%p1082_p11)
}
  0x57   :  { %87 = dma.hbm_to_vmem [thread:$0]  %s1344_s7, 1024, %s82_s17, [#allocation9], %s1121_s28, %s1121_s28, %s1122_s18  }
  0x58   :  { %s1125_s12 = smov [#allocation11]   ;;  %s1086_s22 = scalar_lea.hbm %s1346_s9, 1024 }
  0x59   :  { %s95_s19 = sshll.u32 %s1125_s12, 4  ;;  %p1087_p12 = scmp.ne.s32.totalorder %s1346_s9, %s1086_s22  ;;  %s96_s19 = int_to_ptr.vmem [resolvable:$true] %s95_s19 }
  0x5a   :  { %p1090_p13 = scmp.lt.u32.totalorder %s1086_s22, %s1346_s9 }
  0x5c   :  { %p1092_p0 = pnand %p1090_p13, %p1087_p12 }
  0x5e   :  { %1095 = shalt.err (!%p1092_p0)
}
  0x5f   :  { %s1096_s27 = scalar_lea.vmem %s96_s19, 1024  ;;  %p1101_p2 = scmp.lt.s32.totalorder %s96_s19, %s96_s19 }
  0x60   :  { %p1097_p1 = scmp.ne.s32.totalorder %s96_s19, %s1096_s27  ;;  %p1102_p3 = scmp.lt.s32.totalorder %s1096_s27, %s1096_s27 }
  0x62   :  { %p1103_p4 = por %p1102_p3, %p1101_p2 }
  0x64   :  { %p1104_p5 = pnand %p1103_p4, %p1097_p1 }
  0x66   :  { %1107 = shalt.err (!%p1104_p5)
}
  0x67   :  { %101 = dma.hbm_to_vmem [thread:$0]  %s1346_s9, 1024, %s96_s19, [#allocation12], %s1121_s28, %s1121_s28, %s1122_s18  }
  0x68   :  { %1108 = dma.done.wait [#allocation4], 128  }
  0x69   :  { %1109 = vsyncadd [#allocation4], 4294967168 }
  0x6a   :  { %1110 = dma.done.wait [#allocation6], 2560  }
  0x6b   :  { %1111 = vsyncadd [#allocation6], 4294964736 }
  0x6c   :  { %1112 = dma.done.wait [#allocation9], 2048  }
  0x6d   :  { %1113 = vsyncadd [#allocation9], 4294965248 }
  0x6e   :  { %1114 = dma.done.wait [#allocation12], 1024  }
  0x6f   :  { %1115 = vsyncadd [#allocation12], 4294966272  ;;  %v1126_v1 = vmov 0   ;;  %v930_v2 = vld [vmem:[#allocation5 + $0x4] ss:$8 sps:$4 sm:$0xff]   ;;  %v127_v6 = vld [vmem:[#allocation3] sm:$0xff]  ;;  %v135_v31 = vlaneseq }
  0x70   :  { %201 = vmatprep.mubr.bf16.mxu0 %v1126_v1  ;;  %v932_v3 = vld [vmem:[#allocation5] ss:$8 sps:$4 sm:$0xff]   ;;  %169 = vmatprep.subr.bf16.mxu0 %v930_v2  ;;  %v933_v4 = vld [vmem:[#allocation5 + $0x14] ss:$8 sps:$4 sm:$0xff]   ;;  %v935_v5 = vld [vmem:[#allocation5 + $0x10] ss:$8 sps:$4 sm:$0xff]   ;;  %v128_v10 = vpack.c.bf16 %v127_v6, %v127_v6 }
  0x71   :  { %170 = vmatpush1.bf16.msra.mxu0 %v932_v3  ;;  %v936_v7 = vld [vmem:[#allocation7 + $0x40] sm:$0xff]   ;;  %v938_v9 = vld [vmem:[#allocation7 + $0x48] sm:$0xff]   ;;  %vm165_vm0 = vcmask 261120   ;;  %v940_v12 = vld [vmem:[#allocation7 + $0x50] sm:$0xff]   ;;  %v1127_v25 = vmov 0.0   ;;  %v136_v32 = vshrl.u32 %v135_v31, 7 }
  0x72   :  { %171 = vmatprep.subr.bf16.mxu0 %v933_v4  ;;  %v937_v8 = vld [vmem:[#allocation7] sm:$0xff]   ;;  %808 = vmatprep.subr.bf16.mxu1 %v936_v7  ;;  %v939_v11 = vld [vmem:[#allocation7 + $0x8] sm:$0xff]   ;;  %v941_v13 = vld [vmem:[#allocation7 + $0x10] sm:$0xff]   ;;  %vm1128_vm1 = vmmov 0   ;;  %vm747_vm2 = vcmask 7168  }
  0x73   :  { %809 = vmatpush3.bf16.msra.mxu1 %v937_v8  ;;  %v942_v14 = vld [vmem:[#allocation7 + $0x58] sm:$0xff]   ;;  %v944_v16 = vld [vmem:[#allocation7 + $0x60] sm:$0xff]   ;;  %v946_v18 = vld [vmem:[#allocation7 + $0x68] sm:$0xff]   ;;  %v137_v33 = vsub.s32 0, %v136_v32  ;;  %v141_v35 = vsub.s32 1, %v136_v32 }
  0x74   :  { %810 = vmatprep.subr.bf16.mxu1 %v938_v9  ;;  %v943_v15 = vld [vmem:[#allocation7 + $0x18] sm:$0xff]   ;;  %v945_v17 = vld [vmem:[#allocation7 + $0x20] sm:$0xff]   ;;  %v947_v19 = vld [vmem:[#allocation7 + $0x28] sm:$0xff]  }
  0x75   :  { %172 = vmatpush1.bf16.msra.mxu0 %v935_v5  ;;  %v948_v20 = vld [vmem:[#allocation7 + $0x70] sm:$0xff]   ;;  %v950_v22 = vld [vmem:[#allocation7 + $0x78] sm:$0xff]   ;;  %v952_v24 = vld [vmem:[#allocation8] sm:$0xff]  }
  0x76   :  { %v949_v21 = vld [vmem:[#allocation7 + $0x30] sm:$0xff]   ;;  %v951_v23 = vld [vmem:[#allocation7 + $0x38] sm:$0xff]   ;;  %857 = vmatprep.subr.bf16.mxu0 %v1127_v25  ;;  %v953_v26 = vld [vmem:[#allocation8 + $0x8] sm:$0xff]  }
  0x77   :  { %811 = vmatpush3.bf16.msra.mxu1 %v939_v11  ;;  %v954_v27 = vld [vmem:[#allocation8 + $0x10] sm:$0xff]   ;;  %v955_v28 = vld [vmem:[#allocation8 + $0x18] sm:$0xff]   ;;  %v956_v29 = vld [vmem:[#allocation8 + $0x20] sm:$0xff]  }
  0x78   :  { %761 = vmatmul.mubr.msk.bf16.vlgmr.msra.gmra.mrb[0].mxu0 %vm165_vm0, %v128_v10  ;;  %812 = vmatprep.subr.bf16.mxu1 %v940_v12  ;;  %v957_v30 = vld [vmem:[#allocation8 + $0x28] sm:$0xff]   ;;  %v133_v34 = vld [vmem:[%s1339_s2] sm:$0x3]  ;;  %v960_v50 = vld [vmem:[#allocation10] sm:$0xff]  }
  0x79   :  { %858 = vmatpush3.bf16.msra.mxu0 %v952_v24  ;;  %v138_v36 = vrot.slane %v133_v34, %v137_v33  ;;  %v142_v37 = vrot.slane %v133_v34, %v141_v35  ;;  %v958_v48 = vld [vmem:[#allocation8 + $0x30] sm:$0xff]   ;;  %v959_v49 = vld [vmem:[#allocation8 + $0x38] sm:$0xff]   ;;  %873 = vmatprep.mubr.msk.bf16.mxu0 %vm1128_vm1, %v1127_v25  ;;  %v961_v51 = vld [vmem:[#allocation10 + $0x8] sm:$0xff]  }
  0x7a   :  { %859 = vmatprep.subr.bf16.mxu0 %v1127_v25  ;;  %v962_v52 = vld [vmem:[#allocation10 + $0x10] sm:$0xff]   ;;  %v963_v53 = vld [vmem:[#allocation10 + $0x18] sm:$0xff]   ;;  %v964_v54 = vld [vmem:[#allocation10 + $0x20] sm:$0xff]  }
  0x7b   :  { %813 = vmatpush3.bf16.msra.mxu1 %v941_v13  ;;  %v965_v55 = vld [vmem:[#allocation10 + $0x28] sm:$0xff]   ;;  %v762_v57 = vld [vmem:[%s1341_s4] ss:$0 sm:$0xff]  ;;  %v967_v2 = vld [vmem:[#allocation10 + $0x38] sm:$0xff]  }
  0x7c   :  { %814 = vmatprep.subr.bf16.mxu1 %v942_v14  ;;  %v966_v1 = vld [vmem:[#allocation10 + $0x30] sm:$0xff]   ;;  %v968_v3 = vld [vmem:[#allocation11] sm:$0xff]   ;;  %v969_v4 = vld [vmem:[#allocation11 + $0x8] sm:$0xff]  }
  0x7d   :  { %860 = vmatpush3.bf16.msra.mxu0 %v953_v26  ;;  %v970_v5 = vld [vmem:[#allocation11 + $0x10] sm:$0xff]   ;;  %v971_v6 = vld [vmem:[#allocation11 + $0x18] sm:$0xff]   ;;  %v972_v7 = vld [vmem:[#allocation11 + $0x20] sm:$0xff]  }
  0x7e   :  { %861 = vmatprep.subr.bf16.mxu0 %v1127_v25  ;;  %v973_v8 = vld [vmem:[#allocation11 + $0x28] sm:$0xff]   ;;  %v779_v9 = vld [vmem:[%s1343_s6] ss:$0 sm:$0xff] }
  0x7f   :  { %815 = vmatpush3.bf16.msra.mxu1 %v943_v15  ;;  %v806_v32 = vld [vmem:[%s1348_s11] ss:$0 sm:$0xff] }
  0x80   :  { %816 = vmatprep.subr.bf16.mxu1 %v944_v16 }
  0x81   :  { %862 = vmatpush3.bf16.msra.mxu0 %v954_v27 }
  0x82   :  { %863 = vmatprep.subr.bf16.mxu0 %v1127_v25 }
  0x83   :  { %817 = vmatpush3.bf16.msra.mxu1 %v945_v17  ;;  %v974_v17 = vld [vmem:[#allocation11 + $0x30] sm:$0xff]  }
  0x84   :  { %818 = vmatprep.subr.bf16.mxu1 %v946_v18  ;;  %v975_v18 = vld [vmem:[#allocation11 + $0x38] sm:$0xff]  }
  0x85   :  { %864 = vmatpush3.bf16.msra.mxu0 %v955_v28  ;;  %v797_v28 = vld [vmem:[%s1347_s10] ss:$0 sm:$0xff] }
  0x86   :  { %865 = vmatprep.subr.bf16.mxu0 %v1127_v25 }
  0x87   :  { %819 = vmatpush3.bf16.msra.mxu1 %v947_v19  ;;  %v788_v19 = vld [vmem:[%s1345_s8] ss:$0 sm:$0xff] }
  0x88   :  { %820 = vmatprep.subr.bf16.mxu1 %v948_v20 }
  0x89   :  { %866 = vmatpush3.bf16.msra.mxu0 %v956_v29 }
  0x8a   :  { %867 = vmatprep.subr.bf16.mxu0 %v1127_v25 }
  0x8b   :  { %821 = vmatpush3.bf16.msra.mxu1 %v949_v21 }
  0x8c   :  { %822 = vmatprep.subr.bf16.mxu1 %v950_v22 }
  0x8d   :  { %868 = vmatpush3.bf16.msra.mxu0 %v957_v30 }
  0x8e   :  { %869 = vmatprep.subr.bf16.mxu0 %v1127_v25 }
  0x8f   :  { %823 = vmatpush3.bf16.msra.mxu1 %v951_v23 }
  0x90   :  { %877 = vmatprep.subr.bf16.mxu1 %v1127_v25 }
  0x91   :  { %870 = vmatpush3.bf16.msra.mxu0 %v958_v48 }
  0x92   :  { %871 = vmatprep.subr.bf16.mxu0 %v1127_v25 }
  0x95   :  { %872 = vmatpush3.bf16.msra.mxu0 %v959_v49 }
  0x96   :  { %897 = vmatprep.subr.bf16.mxu0 %v1127_v25 }
 0x14b   :  { %v203_v38 = vpop.f32.mrb[0].mxu0 }
 0x14c   :  { %v204_v39 = vadd.f32 %v203_v38, %v138_v36  ;;  %v205_v40 = vpop.f32.mrb[1].mxu0  ;;  %v807_v36 = vld [vmem:[#allocation2] ss:$0 sm:$0xff] }
 0x14d   :  { %v206_v41 = vadd.f32 %v205_v40, %v142_v37  ;;  %v207_v42 = vpop.f32.mrb[2].mxu0 }
 0x14e   :  { %v210_v43 = vmax.f32 %v204_v39, 0.0  ;;  %v208_v44 = vpop.f32.mrb[3].mxu0 }
 0x14f   :  { %v211_v45 = vmax.f32 %v206_v41, 0.0 }
 0x150   :  { %v212_v47 = vpack.c.bf16 %v210_v43, %v210_v43 }
 0x151   :  { %v213_v46 = vpack.c.bf16 %v211_v45, %v211_v45 }
 0x153   :  { %381 = vmatprep.mubr.bf16.mxu1 %v213_v46 }
 0x154   :  { %382 = vmatmul.mubr.bf16.vlgmr.msra.gmra.mrb[0].mxu1 %v212_v47 }
 0x155   :  { %893 = vmatprep.mubr.msk.bf16.mxu1 %vm1128_vm1, %v1127_v25  ;;  %878 = vmatpush3.bf16.msra.mxu1 %v960_v50 }
 0x156   :  { %879 = vmatprep.subr.bf16.mxu1 %v1127_v25 }
 0x159   :  { %880 = vmatpush3.bf16.msra.mxu1 %v961_v51 }
 0x15a   :  { %881 = vmatprep.subr.bf16.mxu1 %v1127_v25 }
 0x15d   :  { %882 = vmatpush3.bf16.msra.mxu1 %v962_v52 }
 0x15e   :  { %883 = vmatprep.subr.bf16.mxu1 %v1127_v25 }
 0x161   :  { %884 = vmatpush3.bf16.msra.mxu1 %v963_v53 }
 0x162   :  { %885 = vmatprep.subr.bf16.mxu1 %v1127_v25 }
 0x165   :  { %886 = vmatpush3.bf16.msra.mxu1 %v964_v54 }
 0x166   :  { %887 = vmatprep.subr.bf16.mxu1 %v1127_v25 }
 0x169   :  { %888 = vmatpush3.bf16.msra.mxu1 %v965_v55 }
 0x16a   :  { %889 = vmatprep.subr.bf16.mxu1 %v1127_v25 }
 0x16d   :  { %890 = vmatpush3.bf16.msra.mxu1 %v966_v1 }
 0x16e   :  { %891 = vmatprep.subr.bf16.mxu1 %v1127_v25 }
 0x171   :  { %892 = vmatpush3.bf16.msra.mxu1 %v967_v2 }
 0x227   :  { %v824_v56 = vpop.f32.mrb[0].mxu1 }
 0x228   :  { %v825_v58 = vpop.f32.mrb[1].mxu1 }
 0x229   :  { %v826_v59 = vadd.f32 %v825_v58, %v824_v56  ;;  %v827_v60 = vpop.f32.mrb[2].mxu1 }
 0x22a   :  { %v828_v61 = vpop.f32.mrb[3].mxu1 }
 0x22b   :  { %v384_v62 = vadd.f32 %v826_v59, %v762_v57 }
 0x22d   :  { %v389_v63 = vmax.f32 %v384_v62, 0.0 }
 0x22f   :  { %v390_v0 = vpack.c.bf16 %v389_v63, %v389_v63 }
 0x231   :  { %874 = vmatmul.mubr.bf16.vlgmr.msra.gmra.mrb[4].mxu0 %v390_v0 }
 0x232   :  { %913 = vmatprep.mubr.msk.bf16.mxu0 %vm1128_vm1, %v1127_v25  ;;  %898 = vmatpush3.bf16.msra.mxu0 %v968_v3 }
 0x233   :  { %899 = vmatprep.subr.bf16.mxu0 %v1127_v25 }
 0x236   :  { %900 = vmatpush3.bf16.msra.mxu0 %v969_v4 }
 0x237   :  { %901 = vmatprep.subr.bf16.mxu0 %v1127_v25 }
 0x23a   :  { %902 = vmatpush3.bf16.msra.mxu0 %v970_v5 }
 0x23b   :  { %903 = vmatprep.subr.bf16.mxu0 %v1127_v25 }
 0x23e   :  { %904 = vmatpush3.bf16.msra.mxu0 %v971_v6 }
 0x23f   :  { %905 = vmatprep.subr.bf16.mxu0 %v1127_v25 }
 0x242   :  { %906 = vmatpush3.bf16.msra.mxu0 %v972_v7 }
 0x243   :  { %907 = vmatprep.subr.bf16.mxu0 %v1127_v25 }
 0x246   :  { %908 = vmatpush3.bf16.msra.mxu0 %v973_v8 }
 0x247   :  { %909 = vmatprep.subr.bf16.mxu0 %v1127_v25 }
 0x24a   :  { %910 = vmatpush3.bf16.msra.mxu0 %v974_v17 }
 0x24b   :  { %911 = vmatprep.subr.bf16.mxu0 %v1127_v25 }
 0x24e   :  { %912 = vmatpush3.bf16.msra.mxu0 %v975_v18 }
 0x304   :  { %v496_v10 = vpop.f32.mrb[4].mxu0 }
 0x305   :  { %v497_v11 = vadd.f32 %v779_v9, %v496_v10  ;;  %v875_v12 = vpop.f32.mrb[5].mxu0 }
 0x306   :  { %v499_v13 = vpop.f32.mrb[6].mxu0 }
 0x307   :  { %v502_v14 = vmax.f32 %v497_v11, 0.0  ;;  %v876_v15 = vpop.f32.mrb[7].mxu0 }
 0x309   :  { %v503_v16 = vpack.c.bf16 %v502_v14, %v502_v14 }
 0x30b   :  { %894 = vmatmul.mubr.bf16.vlgmr.msra.gmra.mrb[4].mxu1 %v503_v16 }
 0x3de   :  { %v609_v20 = vpop.f32.mrb[4].mxu1 }
 0x3df   :  { %v610_v21 = vadd.f32 %v788_v19, %v609_v20  ;;  %v895_v22 = vpop.f32.mrb[5].mxu1 }
 0x3e0   :  { %v612_v23 = vpop.f32.mrb[6].mxu1 }
 0x3e1   :  { %v615_v24 = vmax.f32 %v610_v21, 0.0  ;;  %v896_v26 = vpop.f32.mrb[7].mxu1 }
 0x3e3   :  { %v616_v27 = vpack.c.bf16 %v615_v24, %v615_v24 }
 0x3e5   :  { %914 = vmatmul.mubr.bf16.vlgmr.msra.gmra.mrb[8].mxu0 %v616_v27 }
 0x4b8   :  { %v722_v29 = vpop.f32.mrb[8].mxu0 }
 0x4b9   :  { %v723_v25 = vadd.f32 %v797_v28, %v722_v29  ;;  %v915_v30 = vpop.f32.mrb[9].mxu0 }
 0x4ba   :  { %v725_v31 = vpop.f32.mrb[10].mxu0 }
 0x4bb   :  { %v728_v33 = vmax.f32 %v723_v25, 0.0  ;;  %v916_v34 = vpop.f32.mrb[11].mxu0 }
 0x4bd   :  { %v737_v35 = vmul.f32 %v806_v32, %v728_v33 }
 0x4bf   :  { %738 = vadd.xlane.f32.xlu0 %v737_v35 }
 0x54c   :  { %v739_v37 = vpop.xlane.xlu0 %738 }
 0x54d   :  { %v746_v38 = vadd.f32 %v807_v36, %v739_v37 }
 0x54f   :  { %748 = vst.msk [vmem:[%s1350_s13] sm:$0xff] %vm747_vm2, %v746_v38 }
 0x550   :  { %753 = vsyncpa [#allocation4], 1 }
 0x551   :  { %754 = vsyncpa [#allocation6], 1 }
 0x552   :  { %755 = vsyncpa [#allocation9], 1 }
 0x553   :  { %756 = vsyncpa [#allocation12], 1 }

// kernel: tpu_custom_call.1
= control target key start
LH: loop header
LB: loop body
LE: loop exit
PB: predicated region body
PF: predicated region fallthrough
CT: control target
= control target key end

     0   :  { %s1337_s0 = inlined_call_operand.hbm [shape: f32[8,32], index: 0, kind: input, shape index: {}]   ;;  %s1338_s1 = inlined_call_operand.hbm [shape: bf16[32,256], index: 1, kind: input, shape index: {}]   ;;  %s1339_s2 = inlined_call_operand.vmem [shape: f32[1,256], index: 2, kind: input, shape index: {}]   ;;  %s1340_s3 = inlined_call_operand.hbm [shape: bf16[256,128], index: 3, kind: input, shape index: {}]   ;;  %s1341_s4 = inlined_call_operand.vmem [shape: f32[1,128], index: 4, kind: input, shape index: {}]   ;;  %s1342_s5 = inlined_call_operand.hbm [shape: bf16[128,128], index: 5, kind: input, shape index: {}]   ;;  %s1343_s6 = inlined_call_operand.vmem [shape: f32[1,128], index: 6, kind: input, shape index: {}]   ;;  %s1344_s7 = inlined_call_operand.hbm [shape: bf16[128,128], index: 7, kind: input, shape index: {}]   ;;  %s1345_s8 = inlined_call_operand.vmem [shape: f32[1,128], index: 8, kind: input, shape index: {}]   ;;  %s1346_s9 = inlined_call_operand.hbm [shape: bf16[128,128], index: 9, kind: input, shape index: {}]   ;;  %s1347_s10 = inlined_call_operand.vmem [shape: f32[1,128], index: 10, kind: input, shape index: {}]   ;;  %s1348_s11 = inlined_call_operand.vmem [shape: f32[1,128], index: 11, kind: input, shape index: {}]   ;;  %s1349_s12 = inlined_call_operand.<no memory space> [shape: f32[1,1], index: 12, kind: input, shape index: {}]   ;;  %s1350_s13 = inlined_call_operand.vmem [shape: f32[8,1], index: 13, kind: output, shape index: {}]  }
   0x1   :  { %v18_v0 = vstv %s1349_s12 }
   0x2   :  { %19 = vst [vmem:[#allocation2] sm:$0x1] %v18_v0 }
   0x3   :  { %20 = vsyncpa [#allocation4], 0 }
   0x4   :  { %21 = vsyncpa [#allocation6], 0 }
   0x5   :  { %22 = vsyncpa [#allocation9], 0 }
   0x6   :  { %23 = vsyncpa [#allocation12], 0  ;;  %s1116_s27 = smov [#allocation5]   ;;  %s976_s14 = scalar_lea.hbm %s1338_s1, 512 }
   0x7   :  { %s39_s28 = sshll.u32 %s1116_s27, 4  ;;  %p977_p0 = scmp.ne.s32.totalorder %s1338_s1, %s976_s14  ;;  %s40_s28 = int_to_ptr.vmem [resolvable:$true] %s39_s28 }
   0x8   :  { %p980_p1 = scmp.lt.u32.totalorder %s976_s14, %s1338_s1 }
   0xa   :  { %p982_p2 = pnand %p980_p1, %p977_p0 }
   0xc   :  { %985 = shalt.err (!%p982_p2)
}
   0xd   :  { %s986_s12 = scalar_lea.vmem %s40_s28, 512  ;;  %p991_p4 = scmp.lt.s32.totalorder %s40_s28, %s40_s28 }
   0xe   :  { %p987_p3 = scmp.ne.s32.totalorder %s40_s28, %s986_s12  ;;  %p992_p5 = scmp.lt.s32.totalorder %s986_s12, %s986_s12 }
  0x10   :  { %p993_p6 = por %p992_p5, %p991_p4 }
  0x12   :  { %p994_p7 = pnand %p993_p6, %p987_p3 }
  0x14   :  { %997 = shalt.err (!%p994_p7)
}
  0x15   :  { %s1117_s19 = smov 128   ;;  %s1118_s20 = smov 8  }
  0x16   :  { %45 = dma.hbm_to_vmem [thread:$0]  %s1338_s1, 512, %s40_s28, [#allocation6], %s1117_s19, %s1117_s19, %s1118_s20  }
  0x17   :  { %s1119_s23 = smov [#allocation8]   ;;  %s1120_s25 = smov [#allocation3]  }
  0x18   :  { %s67_s24 = sshll.u32 %s1119_s23, 4  ;;  %s30_s26 = sshll.u32 %s1120_s25, 4  ;;  %s68_s24 = int_to_ptr.vmem [resolvable:$true] %s67_s24  ;;  %s31_s26 = int_to_ptr.vmem [resolvable:$true] %s30_s26 }
  0x19   :  { %s998_s30 = scalar_lea.hbm %s1342_s5, 1024 }
  0x1a   :  { %p999_p8 = scmp.ne.s32.totalorder %s1342_s5, %s998_s30  ;;  %p1002_p9 = scmp.lt.u32.totalorder %s998_s30, %s1342_s5 }
  0x1c   :  { %p1004_p10 = pnand %p1002_p9, %p999_p8 }
  0x1e   :  { %1007 = shalt.err (!%p1004_p10)
}
  0x1f   :  { %s1008_s1 = scalar_lea.vmem %s68_s24, 1024  ;;  %p1013_p12 = scmp.lt.s32.totalorder %s68_s24, %s68_s24 }
  0x20   :  { %p1009_p11 = scmp.ne.s32.totalorder %s68_s24, %s1008_s1  ;;  %p1014_p13 = scmp.lt.s32.totalorder %s1008_s1, %s1008_s1 }
  0x22   :  { %p1015_p0 = por %p1014_p13, %p1013_p12 }
  0x24   :  { %p1016_p1 = pnand %p1015_p0, %p1009_p11 }
  0x26   :  { %1019 = shalt.err (!%p1016_p1)
}
  0x27   :  { %s1121_s28 = smov 64   ;;  %s1122_s18 = smov 4  }
  0x28   :  { %73 = dma.hbm_to_vmem [thread:$0]  %s1342_s5, 1024, %s68_s24, [#allocation9], %s1121_s28, %s1121_s28, %s1122_s18  }
  0x29   :  { %s1020_s22 = scalar_lea.hbm %s1337_s0, 128 }
  0x2a   :  { %p1021_p2 = scmp.ne.s32.totalorder %s1337_s0, %s1020_s22  ;;  %p1024_p3 = scmp.lt.u32.totalorder %s1020_s22, %s1337_s0 }
  0x2c   :  { %p1026_p4 = pnand %p1024_p3, %p1021_p2 }
  0x2e   :  { %1029 = shalt.err (!%p1026_p4)
}
  0x2f   :  { %s1030_s30 = scalar_lea.vmem %s31_s26, 128  ;;  %p1035_p6 = scmp.lt.s32.totalorder %s31_s26, %s31_s26 }
  0x30   :  { %p1031_p5 = scmp.ne.s32.totalorder %s31_s26, %s1030_s30  ;;  %p1036_p7 = scmp.lt.s32.totalorder %s1030_s30, %s1030_s30 }
  0x32   :  { %p1037_p8 = por %p1036_p7, %p1035_p6 }
  0x34   :  { %p1038_p9 = pnand %p1037_p8, %p1031_p5 }
  0x36   :  { %1041 = shalt.err (!%p1038_p9)
}
  0x37   :  { %33 = dma.hbm_to_vmem [thread:$0]  %s1337_s0, 128, %s31_s26, [#allocation4]  }
  0x38   :  { %s1123_s14 = smov [#allocation7]   ;;  %s1124_s16 = smov [#allocation10]  }
  0x39   :  { %s53_s15 = sshll.u32 %s1123_s14, 4  ;;  %s81_s17 = sshll.u32 %s1124_s16, 4  ;;  %s54_s15 = int_to_ptr.vmem [resolvable:$true] %s53_s15  ;;  %s82_s17 = int_to_ptr.vmem [resolvable:$true] %s81_s17 }
  0x3a   :  { %s1042_s19 = scalar_lea.hbm %s1340_s3, 2048 }
  0x3b   :  { %p1043_p10 = scmp.ne.s32.totalorder %s1340_s3, %s1042_s19  ;;  %p1046_p11 = scmp.lt.u32.totalorder %s1042_s19, %s1340_s3 }
  0x3d   :  { %p1048_p12 = pnand %p1046_p11, %p1043_p10 }
  0x3f   :  { %1051 = shalt.err (!%p1048_p12)
}
  0x40   :  { %s1052_s0 = scalar_lea.vmem %s54_s15, 2048  ;;  %p1057_p0 = scmp.lt.s32.totalorder %s54_s15, %s54_s15 }
  0x41   :  { %p1053_p13 = scmp.ne.s32.totalorder %s54_s15, %s1052_s0  ;;  %p1058_p1 = scmp.lt.s32.totalorder %s1052_s0, %s1052_s0 }
  0x43   :  { %p1059_p2 = por %p1058_p1, %p1057_p0 }
  0x45   :  { %p1060_p3 = pnand %p1059_p2, %p1053_p13 }
  0x47   :  { %1063 = shalt.err (!%p1060_p3)
}
  0x48   :  { %59 = dma.hbm_to_vmem [thread:$0]  %s1340_s3, 2048, %s54_s15, [#allocation6], %s1121_s28, %s1121_s28, %s1122_s18  }
  0x49   :  { %s1064_s30 = scalar_lea.hbm %s1344_s7, 1024 }
  0x4a   :  { %p1065_p4 = scmp.ne.s32.totalorder %s1344_s7, %s1064_s30  ;;  %p1068_p5 = scmp.lt.u32.totalorder %s1064_s30, %s1344_s7 }
  0x4c   :  { %p1070_p6 = pnand %p1068_p5, %p1065_p4 }
  0x4e   :  { %1073 = shalt.err (!%p1070_p6)
}
  0x4f   :  { %s1074_s1 = scalar_lea.vmem %s82_s17, 1024  ;;  %p1079_p8 = scmp.lt.s32.totalorder %s82_s17, %s82_s17 }
  0x50   :  { %p1075_p7 = scmp.ne.s32.totalorder %s82_s17, %s1074_s1  ;;  %p1080_p9 = scmp.lt.s32.totalorder %s1074_s1, %s1074_s1 }
  0x52   :  { %p1081_p10 = por %p1080_p9, %p1079_p8 }
  0x54   :  { %p1082_p11 = pnand %p1081_p10, %p1075_p7 }
  0x56   :  { %1085 = shalt.err (!%p1082_p11)
}
  0x57   :  { %87 = dma.hbm_to_vmem [thread:$0]  %s1344_s7, 1024, %s82_s17, [#allocation9], %s1121_s28, %s1121_s28, %s1122_s18  }
  0x58   :  { %s1125_s12 = smov [#allocation11]   ;;  %s1086_s22 = scalar_lea.hbm %s1346_s9, 1024 }
  0x59   :  { %s95_s19 = sshll.u32 %s1125_s12, 4  ;;  %p1087_p12 = scmp.ne.s32.totalorder %s1346_s9, %s1086_s22  ;;  %s96_s19 = int_to_ptr.vmem [resolvable:$true] %s95_s19 }
  0x5a   :  { %p1090_p13 = scmp.lt.u32.totalorder %s1086_s22, %s1346_s9 }
  0x5c   :  { %p1092_p0 = pnand %p1090_p13, %p1087_p12 }
  0x5e   :  { %1095 = shalt.err (!%p1092_p0)
}
  0x5f   :  { %s1096_s27 = scalar_lea.vmem %s96_s19, 1024  ;;  %p1101_p2 = scmp.lt.s32.totalorder %s96_s19, %s96_s19 }
  0x60   :  { %p1097_p1 = scmp.ne.s32.totalorder %s96_s19, %s1096_s27  ;;  %p1102_p3 = scmp.lt.s32.totalorder %s1096_s27, %s1096_s27 }
  0x62   :  { %p1103_p4 = por %p1102_p3, %p1101_p2 }
  0x64   :  { %p1104_p5 = pnand %p1103_p4, %p1097_p1 }
  0x66   :  { %1107 = shalt.err (!%p1104_p5)
}
  0x67   :  { %101 = dma.hbm_to_vmem [thread:$0]  %s1346_s9, 1024, %s96_s19, [#allocation12], %s1121_s28, %s1121_s28, %s1122_s18  }
  0x68   :  { %1108 = dma.done.wait [#allocation4], 128  }
  0x69   :  { %1109 = vsyncadd [#allocation4], 4294967168 }
  0x6a   :  { %1110 = dma.done.wait [#allocation6], 2560  }
  0x6b   :  { %1111 = vsyncadd [#allocation6], 4294964736 }
  0x6c   :  { %1112 = dma.done.wait [#allocation9], 2048  }
  0x6d   :  { %1113 = vsyncadd [#allocation9], 4294965248 }
  0x6e   :  { %1114 = dma.done.wait [#allocation12], 1024  }
  0x6f   :  { %1115 = vsyncadd [#allocation12], 4294966272  ;;  %v1126_v1 = vmov 0   ;;  %v930_v2 = vld [vmem:[#allocation5 + $0x4] ss:$8 sps:$4 sm:$0xff]   ;;  %v127_v6 = vld [vmem:[#allocation3] sm:$0xff]  ;;  %v135_v31 = vlaneseq }
  0x70   :  { %201 = vmatprep.mubr.bf16.mxu0 %v1126_v1  ;;  %v932_v3 = vld [vmem:[#allocation5] ss:$8 sps:$4 sm:$0xff]   ;;  %169 = vmatprep.subr.bf16.mxu0 %v930_v2  ;;  %v933_v4 = vld [vmem:[#allocation5 + $0x14] ss:$8 sps:$4 sm:$0xff]   ;;  %v935_v5 = vld [vmem:[#allocation5 + $0x10] ss:$8 sps:$4 sm:$0xff]   ;;  %v128_v10 = vpack.c.bf16 %v127_v6, %v127_v6 }
  0x71   :  { %170 = vmatpush1.bf16.msra.mxu0 %v932_v3  ;;  %v936_v7 = vld [vmem:[#allocation7 + $0x40] sm:$0xff]   ;;  %v938_v9 = vld [vmem:[#allocation7 + $0x48] sm:$0xff]   ;;  %vm165_vm0 = vcmask 261120   ;;  %v940_v12 = vld [vmem:[#allocation7 + $0x50] sm:$0xff]   ;;  %v1127_v25 = vmov 0.0   ;;  %v136_v32 = vshrl.u32 %v135_v31, 7 }
  0x72   :  { %171 = vmatprep.subr.bf16.mxu0 %v933_v4  ;;  %v937_v8 = vld [vmem:[#allocation7] sm:$0xff]   ;;  %808 = vmatprep.subr.bf16.mxu1 %v936_v7  ;;  %v939_v11 = vld [vmem:[#allocation7 + $0x8] sm:$0xff]   ;;  %v941_v13 = vld [vmem:[#allocation7 + $0x10] sm:$0xff]   ;;  %vm1128_vm1 = vmmov 0   ;;  %vm747_vm2 = vcmask 7168  }
  0x73   :  { %809 = vmatpush3.bf16.msra.mxu1 %v937_v8  ;;  %v942_v14 = vld [vmem:[#allocation7 + $0x58] sm:$0xff]   ;;  %v944_v16 = vld [vmem:[#allocation7 + $0x60] sm:$0xff]   ;;  %v946_v18 = vld [vmem:[#allocation7 + $0x68] sm:$0xff]   ;;  %v137_v33 = vsub.s32 0, %v136_v32  ;;  %v141_v35 = vsub.s32 1, %v136_v32 }
  0x74   :  { %810 = vmatprep.subr.bf16.mxu1 %v938_v9  ;;  %v943_v15 = vld [vmem:[#allocation7 + $0x18] sm:$0xff]   ;;  %v945_v17 = vld [vmem:[#allocation7 + $0x20] sm:$0xff]   ;;  %v947_v19 = vld [vmem:[#allocation7 + $0x28] sm:$0xff]  }
  0x75   :  { %172 = vmatpush1.bf16.msra.mxu0 %v935_v5  ;;  %v948_v20 = vld [vmem:[#allocation7 + $0x70] sm:$0xff]   ;;  %v950_v22 = vld [vmem:[#allocation7 + $0x78] sm:$0xff]   ;;  %v952_v24 = vld [vmem:[#allocation8] sm:$0xff]  }
  0x76   :  { %v949_v21 = vld [vmem:[#allocation7 + $0x30] sm:$0xff]   ;;  %v951_v23 = vld [vmem:[#allocation7 + $0x38] sm:$0xff]   ;;  %857 = vmatprep.subr.bf16.mxu0 %v1127_v25  ;;  %v953_v26 = vld [vmem:[#allocation8 + $0x8] sm:$0xff]  }
  0x77   :  { %811 = vmatpush3.bf16.msra.mxu1 %v939_v11  ;;  %v954_v27 = vld [vmem:[#allocation8 + $0x10] sm:$0xff]   ;;  %v955_v28 = vld [vmem:[#allocation8 + $0x18] sm:$0xff]   ;;  %v956_v29 = vld [vmem:[#allocation8 + $0x20] sm:$0xff]  }
  0x78   :  { %761 = vmatmul.mubr.msk.bf16.vlgmr.msra.gmra.mrb[0].mxu0 %vm165_vm0, %v128_v10  ;;  %812 = vmatprep.subr.bf16.mxu1 %v940_v12  ;;  %v957_v30 = vld [vmem:[#allocation8 + $0x28] sm:$0xff]   ;;  %v133_v34 = vld [vmem:[%s1339_s2] sm:$0x3]  ;;  %v960_v50 = vld [vmem:[#allocation10] sm:$0xff]  }
  0x79   :  { %858 = vmatpush3.bf16.msra.mxu0 %v952_v24  ;;  %v138_v36 = vrot.slane %v133_v34, %v137_v33  ;;  %v142_v37 = vrot.slane %v133_v34, %v141_v35  ;;  %v958_v48 = vld [vmem:[#allocation8 + $0x30] sm:$0xff]   ;;  %v959_v49 = vld [vmem:[#allocation8 + $0x38] sm:$0xff]   ;;  %873 = vmatprep.mubr.msk.bf16.mxu0 %vm1128_vm1, %v1127_v25  ;;  %v961_v51 = vld [vmem:[#allocation10 + $0x8] sm:$0xff]  }
  0x7a   :  { %859 = vmatprep.subr.bf16.mxu0 %v1127_v25  ;;  %v962_v52 = vld [vmem:[#allocation10 + $0x10] sm:$0xff]   ;;  %v963_v53 = vld [vmem:[#allocation10 + $0x18] sm:$0xff]   ;;  %v964_v54 = vld [vmem:[#allocation10 + $0x20] sm:$0xff]  }
  0x7b   :  { %813 = vmatpush3.bf16.msra.mxu1 %v941_v13  ;;  %v965_v55 = vld [vmem:[#allocation10 + $0x28] sm:$0xff]   ;;  %v762_v57 = vld [vmem:[%s1341_s4] ss:$0 sm:$0xff]  ;;  %v967_v2 = vld [vmem:[#allocation10 + $0x38] sm:$0xff]  }
  0x7c   :  { %814 = vmatprep.subr.bf16.mxu1 %v942_v14  ;;  %v966_v1 = vld [vmem:[#allocation10 + $0x30] sm:$0xff]   ;;  %v968_v3 = vld [vmem:[#allocation11] sm:$0xff]   ;;  %v969_v4 = vld [vmem:[#allocation11 + $0x8] sm:$0xff]  }
  0x7d   :  { %860 = vmatpush3.bf16.msra.mxu0 %v953_v26  ;;  %v970_v5 = vld [vmem:[#allocation11 + $0x10] sm:$0xff]   ;;  %v971_v6 = vld [vmem:[#allocation11 + $0x18] sm:$0xff]   ;;  %v972_v7 = vld [vmem:[#allocation11 + $0x20] sm:$0xff]  }
  0x7e   :  { %861 = vmatprep.subr.bf16.mxu0 %v1127_v25  ;;  %v973_v8 = vld [vmem:[#allocation11 + $0x28] sm:$0xff]   ;;  %v779_v9 = vld [vmem:[%s1343_s6] ss:$0 sm:$0xff] }
  0x7f   :  { %815 = vmatpush3.bf16.msra.mxu1 %v943_v15  ;;  %v806_v32 = vld [vmem:[%s1348_s11] ss:$0 sm:$0xff] }
  0x80   :  { %816 = vmatprep.subr.bf16.mxu1 %v944_v16 }
  0x81   :  { %862 = vmatpush3.bf16.msra.mxu0 %v954_v27 }
  0x82   :  { %863 = vmatprep.subr.bf16.mxu0 %v1127_v25 }
  0x83   :  { %817 = vmatpush3.bf16.msra.mxu1 %v945_v17  ;;  %v974_v17 = vld [vmem:[#allocation11 + $0x30] sm:$0xff]  }
  0x84   :  { %818 = vmatprep.subr.bf16.mxu1 %v946_v18  ;;  %v975_v18 = vld [vmem:[#allocation11 + $0x38] sm:$0xff]  }
  0x85   :  { %864 = vmatpush3.bf16.msra.mxu0 %v955_v28  ;;  %v797_v28 = vld [vmem:[%s1347_s10] ss:$0 sm:$0xff] }
  0x86   :  { %865 = vmatprep.subr.bf16.mxu0 %v1127_v25 }
  0x87   :  { %819 = vmatpush3.bf16.msra.mxu1 %v947_v19  ;;  %v788_v19 = vld [vmem:[%s1345_s8] ss:$0 sm:$0xff] }
  0x88   :  { %820 = vmatprep.subr.bf16.mxu1 %v948_v20 }
  0x89   :  { %866 = vmatpush3.bf16.msra.mxu0 %v956_v29 }
  0x8a   :  { %867 = vmatprep.subr.bf16.mxu0 %v1127_v25 }
  0x8b   :  { %821 = vmatpush3.bf16.msra.mxu1 %v949_v21 }
  0x8c   :  { %822 = vmatprep.subr.bf16.mxu1 %v950_v22 }
  0x8d   :  { %868 = vmatpush3.bf16.msra.mxu0 %v957_v30 }
  0x8e   :  { %869 = vmatprep.subr.bf16.mxu0 %v1127_v25 }
  0x8f   :  { %823 = vmatpush3.bf16.msra.mxu1 %v951_v23 }
  0x90   :  { %877 = vmatprep.subr.bf16.mxu1 %v1127_v25 }
  0x91   :  { %870 = vmatpush3.bf16.msra.mxu0 %v958_v48 }
  0x92   :  { %871 = vmatprep.subr.bf16.mxu0 %v1127_v25 }
  0x95   :  { %872 = vmatpush3.bf16.msra.mxu0 %v959_v49 }
  0x96   :  { %897 = vmatprep.subr.bf16.mxu0 %v1127_v25 }
 0x14b   :  { %v203_v38 = vpop.f32.mrb[0].mxu0 }
 0x14c   :  { %v204_v39 = vadd.f32 %v203_v38, %v138_v36  ;;  %v205_v40 = vpop.f32.mrb[1].mxu0  ;;  %v807_v36 = vld [vmem:[#allocation2] ss:$0 sm:$0xff] }
 0x14d   :  { %v206_v41 = vadd.f32 %v205_v40, %v142_v37  ;;  %v207_v42 = vpop.f32.mrb[2].mxu0 }
 0x14e   :  { %v210_v43 = vmax.f32 %v204_v39, 0.0  ;;  %v208_v44 = vpop.f32.mrb[3].mxu0 }
 0x14f   :  { %v211_v45 = vmax.f32 %v206_v41, 0.0 }
 0x150   :  { %v212_v47 = vpack.c.bf16 %v210_v43, %v210_v43 }
 0x151   :  { %v213_v46 = vpack.c.bf16 %v211_v45, %v211_v45 }
 0x153   :  { %381 = vmatprep.mubr.bf16.mxu1 %v213_v46 }
 0x154   :  { %382 = vmatmul.mubr.bf16.vlgmr.msra.gmra.mrb[0].mxu1 %v212_v47 }
 0x155   :  { %893 = vmatprep.mubr.msk.bf16.mxu1 %vm1128_vm1, %v1127_v25  ;;  %878 = vmatpush3.bf16.msra.mxu1 %v960_v50 }
 0x156   :  { %879 = vmatprep.subr.bf16.mxu1 %v1127_v25 }
 0x159   :  { %880 = vmatpush3.bf16.msra.mxu1 %v961_v51 }
 0x15a   :  { %881 = vmatprep.subr.bf16.mxu1 %v1127_v25 }
 0x15d   :  { %882 = vmatpush3.bf16.msra.mxu1 %v962_v52 }
 0x15e   :  { %883 = vmatprep.subr.bf16.mxu1 %v1127_v25 }
 0x161   :  { %884 = vmatpush3.bf16.msra.mxu1 %v963_v53 }
 0x162   :  { %885 = vmatprep.subr.bf16.mxu1 %v1127_v25 }
 0x165   :  { %886 = vmatpush3.bf16.msra.mxu1 %v964_v54 }
 0x166   :  { %887 = vmatprep.subr.bf16.mxu1 %v1127_v25 }
 0x169   :  { %888 = vmatpush3.bf16.msra.mxu1 %v965_v55 }
 0x16a   :  { %889 = vmatprep.subr.bf16.mxu1 %v1127_v25 }
 0x16d   :  { %890 = vmatpush3.bf16.msra.mxu1 %v966_v1 }
 0x16e   :  { %891 = vmatprep.subr.bf16.mxu1 %v1127_v25 }
 0x171   :  { %892 = vmatpush3.bf16.msra.mxu1 %v967_v2 }
 0x227   :  { %v824_v56 = vpop.f32.mrb[0].mxu1 }
 0x228   :  { %v825_v58 = vpop.f32.mrb[1].mxu1 }
 0x229   :  { %v826_v59 = vadd.f32 %v825_v58, %v824_v56  ;;  %v827_v60 = vpop.f32.mrb[2].mxu1 }
 0x22a   :  { %v828_v61 = vpop.f32.mrb[3].mxu1 }
 0x22b   :  { %v384_v62 = vadd.f32 %v826_v59, %v762_v57 }
 0x22d   :  { %v389_v63 = vmax.f32 %v384_v62, 0.0 }
 0x22f   :  { %v390_v0 = vpack.c.bf16 %v389_v63, %v389_v63 }
 0x231   :  { %874 = vmatmul.mubr.bf16.vlgmr.msra.gmra.mrb[4].mxu0 %v390_v0 }
 0x232   :  { %913 = vmatprep.mubr.msk.bf16.mxu0 %vm1128_vm1, %v1127_v25  ;;  %898 = vmatpush3.bf16.msra.mxu0 %v968_v3 }
 0x233   :  { %899 = vmatprep.subr.bf16.mxu0 %v1127_v25 }
 0x236   :  { %900 = vmatpush3.bf16.msra.mxu0 %v969_v4 }
 0x237   :  { %901 = vmatprep.subr.bf16.mxu0 %v1127_v25 }
 0x23a   :  { %902 = vmatpush3.bf16.msra.mxu0 %v970_v5 }
 0x23b   :  { %903 = vmatprep.subr.bf16.mxu0 %v1127_v25 }
 0x23e   :  { %904 = vmatpush3.bf16.msra.mxu0 %v971_v6 }
 0x23f   :  { %905 = vmatprep.subr.bf16.mxu0 %v1127_v25 }
 0x242   :  { %906 = vmatpush3.bf16.msra.mxu0 %v972_v7 }
 0x243   :  { %907 = vmatprep.subr.bf16.mxu0 %v1127_v25 }
 0x246   :  { %908 = vmatpush3.bf16.msra.mxu0 %v973_v8 }
 0x247   :  { %909 = vmatprep.subr.bf16.mxu0 %v1127_v25 }
 0x24a   :  { %910 = vmatpush3.bf16.msra.mxu0 %v974_v17 }
 0x24b   :  { %911 = vmatprep.subr.bf16.mxu0 %v1127_v25 }
 0x24e   :  { %912 = vmatpush3.bf16.msra.mxu0 %v975_v18 }
 0x304   :  { %v496_v10 = vpop.f32.mrb[4].mxu0 }
 0x305   :  { %v497_v11 = vadd.f32 %v779_v9, %v496_v10  ;;  %v875_v12 = vpop.f32.mrb[5].mxu0 }
 0x306   :  { %v499_v13 = vpop.f32.mrb[6].mxu0 }
 0x307   :  { %v502_v14 = vmax.f32 %v497_v11, 0.0  ;;  %v876_v15 = vpop.f32.mrb[7].mxu0 }
 0x309   :  { %v503_v16 = vpack.c.bf16 %v502_v14, %v502_v14 }
 0x30b   :  { %894 = vmatmul.mubr.bf16.vlgmr.msra.gmra.mrb[4].mxu1 %v503_v16 }
 0x3de   :  { %v609_v20 = vpop.f32.mrb[4].mxu1 }
 0x3df   :  { %v610_v21 = vadd.f32 %v788_v19, %v609_v20  ;;  %v895_v22 = vpop.f32.mrb[5].mxu1 }
 0x3e0   :  { %v612_v23 = vpop.f32.mrb[6].mxu1 }
 0x3e1   :  { %v615_v24 = vmax.f32 %v610_v21, 0.0  ;;  %v896_v26 = vpop.f32.mrb[7].mxu1 }
 0x3e3   :  { %v616_v27 = vpack.c.bf16 %v615_v24, %v615_v24 }
 0x3e5   :  { %914 = vmatmul.mubr.bf16.vlgmr.msra.gmra.mrb[8].mxu0 %v616_v27 }
 0x4b8   :  { %v722_v29 = vpop.f32.mrb[8].mxu0 }
 0x4b9   :  { %v723_v25 = vadd.f32 %v797_v28, %v722_v29  ;;  %v915_v30 = vpop.f32.mrb[9].mxu0 }
 0x4ba   :  { %v725_v31 = vpop.f32.mrb[10].mxu0 }
 0x4bb   :  { %v728_v33 = vmax.f32 %v723_v25, 0.0  ;;  %v916_v34 = vpop.f32.mrb[11].mxu0 }
 0x4bd   :  { %v737_v35 = vmul.f32 %v806_v32, %v728_v33 }
 0x4bf   :  { %738 = vadd.xlane.f32.xlu0 %v737_v35 }
 0x54c   :  { %v739_v37 = vpop.xlane.xlu0 %738 }
 0x54d   :  { %v746_v38 = vadd.f32 %v807_v36, %v739_v37 }
 0x54f   :  { %748 = vst.msk [vmem:[%s1350_s13] sm:$0xff] %vm747_vm2, %v746_v38 }
 0x550   :  { %753 = vsyncpa [#allocation4], 1 }
 0x551   :  { %754 = vsyncpa [#allocation6], 1 }
 0x552   :  { %755 = vsyncpa [#allocation9], 1 }
 0x553   :  { %756 = vsyncpa [#allocation12], 1 }

</bundles_post_ra>
